<compile_context>
chip_gen: v6e
topology: v6e:2x2x1
jax: 0.10.0
libtpu: 0.0.40
codegen_flags: <defaults>
</compile_context>

<pallas_src>
import functools

import jax
import jax.numpy as jnp
from jax import lax
from jax.experimental import pallas as pl
from jax.experimental.pallas import tpu as pltpu


# ----------------------------- shared math ----------------------------------


def _layernorm(x, w, b, eps=1e-5):
    x = x.astype(jnp.float32)
    mu = jnp.mean(x, axis=-1, keepdims=True)
    var = jnp.mean((x - mu) ** 2, axis=-1, keepdims=True)
    return (x - mu) * lax.rsqrt(var + eps) * w + b


# ----------------------------- kernels ---------------------------------------


def clip_layers_kernel(x_ref, mask_ref, ln1w_ref, ln1b_ref, wqkv_ref, bqkv_ref,
                       wo_ref, bo_ref, ln2w_ref, ln2b_ref,
                       w1_ref, b1_ref, w2_ref, b2_ref, out_ref, ctx_ref,
                       *, num_heads, seq_len, batch_tile):
    """Whole transformer stack.  grid = (batch_tiles, layers).

    The output block (index constant along the layer axis) is the resident
    f32 residual stream; per-layer bf16 weights stream through VMEM.
    ctx_ref is a bf16 (R, D) staging buffer for per-head attention contexts.
    """
    layer = pl.program_id(1)

    @pl.when(layer == 0)
    def _():                                   # load residual stream once per tile
        out_ref[0] = x_ref[0]

    x = out_ref[0]                             # (R, D) f32, read once per layer
    R, D = x.shape
    S = seq_len
    BT = batch_tile
    H = num_heads
    hd = D // H
    scale = 1.0 / float(hd) ** 0.5

    mask = mask_ref[...]                       # (S, S) f32, resident across layers

    # ---- multi-head self-attention (pre-LN), fused QKV projection ----
    h = _layernorm(x, ln1w_ref[0], ln1b_ref[0])                       # f32
    qkv = jnp.dot(h.astype(jnp.bfloat16), wqkv_ref[0],
                  preferred_element_type=jnp.float32) + bqkv_ref[0]   # (R, 3D) f32

    for hh in range(H):                        # static loop over heads only
        c = hh * hd
        # batch the score / context matmuls over all sequences of the tile
        q_h = qkv[:, c:c + hd].reshape(BT, S, hd).astype(jnp.bfloat16)
        k_h = qkv[:, D + c:D + c + hd].reshape(BT, S, hd).astype(jnp.bfloat16)
        v_h = qkv[:, 2 * D + c:2 * D + c + hd].reshape(BT, S, hd).astype(jnp.bfloat16)
        s = jnp.einsum('bqd,bkd->bqk', q_h, k_h,
                       preferred_element_type=jnp.float32)            # (BT, S, S)
        s = s * scale + mask[None, :, :]
        s = s - jnp.max(s, axis=-1, keepdims=True)
        p = jnp.exp(s)
        inv = pl.reciprocal(jnp.sum(p, axis=-1, keepdims=True), approx=True)
        ctx = jnp.einsum('bqk,bkd->bqd', p.astype(jnp.bfloat16), v_h,
                         preferred_element_type=jnp.float32) * inv    # (BT, S, hd)
        # stage this head's context at its static column offset
        ctx_ref[:, c:c + hd] = ctx.reshape(R, hd).astype(jnp.bfloat16)

    # single full-K output projection for all heads / sequences
    attn = jnp.dot(ctx_ref[...], wo_ref[0],
                   preferred_element_type=jnp.float32) + bo_ref[0]
    x = x + attn                                # residual stays local (no VMEM round trip)

    # ---- MLP (pre-LN, QuickGELU) on the whole (R, D) slab ----
    h2 = _layernorm(x, ln2w_ref[0], ln2b_ref[0])
    m = jnp.dot(h2.astype(jnp.bfloat16), w1_ref[0],
                preferred_element_type=jnp.float32) + b1_ref[0]
    # QuickGELU kept in f32 (v5e EUP has no bf16 path; bf16 sigmoid is a
    # further small win on v6e/v7x only).
    m = m * jax.nn.sigmoid(1.702 * m)
    mo = jnp.dot(m.astype(jnp.bfloat16), w2_ref[0],
                 preferred_element_type=jnp.float32) + b2_ref[0]
    out_ref[0] = x + mo                         # single store per layer


def pool_kernel(x_ref, lnw_ref, lnb_ref, proj_ref, out_ref):
    """Fused ln_final + text_projection on the already-gathered EOT rows."""
    h = _layernorm(x_ref[...], lnw_ref[...], lnb_ref[...])
    out_ref[...] = jnp.dot(h.astype(jnp.bfloat16), proj_ref[...],
                           preferred_element_type=jnp.float32)


# ----------------------------- wrappers --------------------------------------

_STACKED_WEIGHT_KEYS = ('ln1_w', 'ln1_b', 'wqkv', 'bqkv', 'wo', 'bo',
                        'ln2_w', 'ln2_b', 'w1', 'b1', 'w2', 'b2')
_BF16_KEYS = ('wqkv', 'wo', 'w1', 'w2', 'text_proj')


def _prep_kernel_params(p):
    """bf16 weight matrices for the MXU / halved DMA; everything else f32."""
    kp = dict(p)
    for k in _BF16_KEYS:
        kp[k] = p[k].astype(jnp.bfloat16)
    return kp


def _vmem_limit_bytes():
    """Per-generation VMEM budget: ~3/4 of physical, capped at 100 MiB.

    v7x (64 MiB) -> ~48 MiB; v5e/v6e (128 MiB) -> ~96 MiB.
    """
    try:
        cap = pltpu.get_tpu_info().vmem_capacity_bytes
    except Exception:
        cap = 64 * 1024 * 1024                 # conservative fallback
    return min(int(cap * 3 // 4), 100 * 1024 * 1024)


def _pick_batch_tile(B, S, D, vmem_limit):
    """Size batch_tile from the weight-streaming roofline + VMEM budget.

    Arithmetic intensity of the layer loop is ~R FLOPs per weight byte
    (R = batch_tile * S); R ~ 640 keeps even v6e MXU-bound.  Cap R so the
    resident activation slabs + temporaries + double-buffered bf16 weights
    fit the per-generation VMEM limit.
    """
    weight_bytes = 2 * (12 * D * D + 9 * D) * 2          # bf16, double-buffered
    act_bytes_per_row = D * 48                            # in/out blocks, ctx, temps
    budget = max(vmem_limit - weight_bytes, vmem_limit // 4)
    max_rows = max(S, budget // act_bytes_per_row)
    rows = min(640, max_rows)
    bt = max(1, min(B, rows // S))
    while B % bt:
        bt -= 1
    return bt


def clip_transformer_layers(x, kp, num_heads, batch_tile, vmem_limit):
    """x: (B, S, D) f32 (S already sublane-aligned) -> (B, S, D) f32."""
    B, S, D = x.shape
    assert B % batch_tile == 0
    nb = B // batch_tile
    R = batch_tile * S
    xr = x.reshape(nb, R, D)                     # flatten tile host-side (free)
    L = kp['wqkv'].shape[0]

    # causal additive mask, built once host-side and kept resident in VMEM
    neg_mask = jnp.where(jnp.arange(S)[None, :] > jnp.arange(S)[:, None],
                         -1e9, 0.0).astype(jnp.float32)

    act_map = lambda b, l: (b, 0, 0)             # activation: resident across l
    w_map = lambda b, l: (l, 0, 0)               # weights: stream per layer

    weights = [kp[k] for k in _STACKED_WEIGHT_KEYS]
    w_specs = [pl.BlockSpec((1,) + w.shape[1:], w_map) for w in weights]

    out = pl.pallas_call(
        functools.partial(clip_layers_kernel, num_heads=num_heads,
                          seq_len=S, batch_tile=batch_tile),
        out_shape=jax.ShapeDtypeStruct((nb, R, D), jnp.float32),
        grid=(nb, L),
        in_specs=[pl.BlockSpec((1, R, D), act_map),
                  pl.BlockSpec((S, S), lambda b, l: (0, 0))] + w_specs,
        out_specs=pl.BlockSpec((1, R, D), act_map),
        scratch_shapes=[pltpu.VMEM((R, D), jnp.bfloat16)],   # ctx staging buffer
        input_output_aliases={0: 0},             # donate the activation buffer
        compiler_params=pltpu.CompilerParams(
            dimension_semantics=("parallel", "arbitrary"),
            vmem_limit_bytes=vmem_limit),
    )(xr, neg_mask, *weights)
    return out.reshape(B, S, D)


def pool_project(pooled, ln_w, ln_b, proj):
    """Fused ln_final + text_projection on (B, D) pooled EOT rows."""
    B, D = pooled.shape
    E = proj.shape[1]
    return pl.pallas_call(
        pool_kernel,
        out_shape=jax.ShapeDtypeStruct((B, E), jnp.float32),
    )(pooled, ln_w, ln_b, proj)


def clip_text_encoder_forward(tokens, params, num_heads, batch_tile=None):
    """tokens: [B, S] int32 -> text features [B, embed_dim]."""
    B, S = tokens.shape
    D = params['tok_emb'].shape[1]
    vmem_limit = _vmem_limit_bytes()
    kp = _prep_kernel_params(params)

    # Token-embedding lookup + positional embedding (XLA glue; scalar gather
    # has no natural Pallas tile expression).
    x = (params['tok_emb'][tokens] + params['pos_emb'][:S]).astype(jnp.float32)

    # Pad the sequence to a sublane multiple (8) so every in-kernel slice /
    # reshape / store is (8,128)-aligned; the causal mask keeps pad keys out
    # of real query rows, and pad rows are never read back.
    S_pad = ((S + 7) // 8) * 8
    if S_pad != S:
        x = jnp.pad(x, ((0, 0), (0, S_pad - S), (0, 0)))

    if batch_tile is None:
        batch_tile = _pick_batch_tile(B, S_pad, D, vmem_limit)

    x = clip_transformer_layers(x, kp, num_heads, batch_tile, vmem_limit)

    # EOT-row gather (B rows only — XLA glue), then fused ln_final + projection.
    eot = jnp.argmax(tokens, axis=-1)
    pooled = x[jnp.arange(B), eot]                           # (B, D)
    return pool_project(pooled, params['ln_final_w'], params['ln_final_b'],
                        kp['text_proj'])                     # (B, embed_dim)


# ----------------------------- reference (pure JAX, f32) ---------------------


def _ref_forward(tokens, p, num_heads):
    B, S = tokens.shape
    D = p['tok_emb'].shape[1]
    H = num_heads
    hd = D // H
    L = p['wqkv'].shape[0]
    x = p['tok_emb'][tokens] + p['pos_emb'][:S]
    mask = jnp.where(jnp.arange(S)[None, :] > jnp.arange(S)[:, None],
                     -1e9, 0.0).astype(jnp.float32)
    for l in range(L):
        h = _layernorm(x, p['ln1_w'][l], p['ln1_b'][l])
        qkv = h @ p['wqkv'][l] + p['bqkv'][l]
        q, k, v = qkv[..., :D], qkv[..., D:2 * D], qkv[..., 2 * D:]
        q = q.reshape(B, S, H, hd).transpose(0, 2, 1, 3)
        k = k.reshape(B, S, H, hd).transpose(0, 2, 1, 3)
        v = v.reshape(B, S, H, hd).transpose(0, 2, 1, 3)
        s = jnp.einsum('bhqd,bhkd->bhqk', q, k) / (hd ** 0.5) + mask
        a = jnp.einsum('bhqk,bhkd->bhqd', jax.nn.softmax(s, axis=-1), v)
        a = a.transpose(0, 2, 1, 3).reshape(B, S, D)
        x = x + a @ p['wo'][l] + p['bo'][l]
        h = _layernorm(x, p['ln2_w'][l], p['ln2_b'][l])
        h = h @ p['w1'][l] + p['b1'][l]
        h = h * jax.nn.sigmoid(1.702 * h)
        x = x + h @ p['w2'][l] + p['b2'][l]
    x = _layernorm(x, p['ln_final_w'], p['ln_final_b'])
    eot = jnp.argmax(tokens, axis=-1)
    feat = x[jnp.arange(B), eot]
    return feat @ p['text_proj']


# ----------------------------- params init -----------------------------------


def init_params(key, vocab, ctx, width, layers, embed_dim):
    ks = jax.random.split(key, 16)
    D = width
    s = D ** -0.5
    n = jax.random.normal
    p = {
        'tok_emb': (n(ks[0], (vocab, D)) * 0.02).astype(jnp.float32),
        'pos_emb': (n(ks[1], (ctx, D)) * 0.01).astype(jnp.float32),
        'ln_final_w': (1.0 + 0.1 * n(ks[2], (1, D))).astype(jnp.float32),
        'ln_final_b': (0.1 * n(ks[3], (1, D))).astype(jnp.float32),
        'text_proj': (n(ks[4], (D, embed_dim)) * s).astype(jnp.float32),
        # per-layer weights stacked along a leading L axis (layer-fused kernel)
        'ln1_w': (1.0 + 0.1 * n(ks[5], (layers, 1, D))).astype(jnp.float32),
        'ln1_b': (0.1 * n(ks[6], (layers, 1, D))).astype(jnp.float32),
        'wqkv': (n(ks[7], (layers, D, 3 * D)) * s).astype(jnp.float32),
        'bqkv': (0.05 * n(ks[8], (layers, 1, 3 * D))).astype(jnp.float32),
        'wo': (n(ks[9], (layers, D, D)) * s).astype(jnp.float32),
        'bo': (0.05 * n(ks[10], (layers, 1, D))).astype(jnp.float32),
        'ln2_w': (1.0 + 0.1 * n(ks[11], (layers, 1, D))).astype(jnp.float32),
        'ln2_b': (0.1 * n(ks[12], (layers, 1, D))).astype(jnp.float32),
        'w1': (n(ks[13], (layers, D, 4 * D)) * s).astype(jnp.float32),
        'b1': (0.05 * n(ks[14], (layers, 1, 4 * D))).astype(jnp.float32),
        'w2': (n(ks[15], (layers, 4 * D, D)) * ((4 * D) ** -0.5)
               ).astype(jnp.float32),
        'b2': jnp.zeros((layers, 1, D), jnp.float32),
    }
    return p


# ------------------------------- main -----------------------------------------


if __name__ == "__main__":
    B, S = 2, 8
    VOCAB, WIDTH, HEADS, LAYERS, EMBED = 64, 32, 4, 2, 16

    key = jax.random.PRNGKey(0)
    k_param, k_tok = jax.random.split(key)
    params = init_params(k_param, VOCAB, S, WIDTH, LAYERS, EMBED)

    # token ids: BOS-ish 0 at pos 0, random body, EOT = VOCAB-1 (the max id,
    # so argmax(tokens) finds it) at a per-sample position.
    tokens = jax.random.randint(k_tok, (B, S), 1, VOCAB - 1, dtype=jnp.int32)
    tokens = tokens.at[:, 0].set(0)
    eot_pos = jnp.array([S - 3, S - 1])
    tokens = tokens.at[jnp.arange(B), eot_pos].set(VOCAB - 1)

    out = clip_text_encoder_forward(tokens, params, HEADS)
    out = jax.block_until_ready(out)
    assert out.shape == (B, EMBED) and out.dtype == jnp.float32

    ref = jax.block_until_ready(_ref_forward(tokens, params, HEADS))
    # Kernel uses bf16 MXU operands (f32 accumulation / LN / softmax), so
    # compare with a bf16-appropriate tolerance.
    rel_err = float(jnp.max(jnp.abs(out - ref)) /
                    (jnp.max(jnp.abs(ref)) + 1e-6))
    assert rel_err < 5e-2, f"mismatch vs pure-JAX reference: rel-err={rel_err:.4f}"

    print("KERNEL_OK")
</pallas_src>

<mosaic_0001>
module attributes {stable_mosaic.version = 11 : i64} {
  func.func @clip_layers_kernel(%arg0: i32, %arg1: i32, %arg2: memref<1x16x32xf32, #tpu.memory_space<vmem>>, %arg3: memref<8x8xf32, #tpu.memory_space<vmem>>, %arg4: memref<1x1x32xf32, #tpu.memory_space<vmem>>, %arg5: memref<1x1x32xf32, #tpu.memory_space<vmem>>, %arg6: memref<1x32x96xbf16, #tpu.memory_space<vmem>>, %arg7: memref<1x1x96xf32, #tpu.memory_space<vmem>>, %arg8: memref<1x32x32xbf16, #tpu.memory_space<vmem>>, %arg9: memref<1x1x32xf32, #tpu.memory_space<vmem>>, %arg10: memref<1x1x32xf32, #tpu.memory_space<vmem>>, %arg11: memref<1x1x32xf32, #tpu.memory_space<vmem>>, %arg12: memref<1x32x128xbf16, #tpu.memory_space<vmem>>, %arg13: memref<1x1x128xf32, #tpu.memory_space<vmem>>, %arg14: memref<1x128x32xbf16, #tpu.memory_space<vmem>>, %arg15: memref<1x1x32xf32, #tpu.memory_space<vmem>>, %arg16: memref<1x16x32xf32, #tpu.memory_space<vmem>>, %arg17: memref<16x32xbf16, #tpu.memory_space<vmem>>) attributes {dimension_semantics = [#tpu.dimension_semantics<parallel>, #tpu.dimension_semantics<arbitrary>], iteration_bounds = array<i64: 1, 2>, scalar_prefetch = 0 : i64, scratch_operands = 1 : i64, tpu.core_type = #tpu.core_type<tc>, window_params = [{transform_indices = @transform_0, window_bounds = array<i64: 1, 16, 32>}, {pipeline_mode = #tpu.pipeline_mode<synchronous>, transform_indices = @transform_1, window_bounds = array<i64: 8, 8>}, {transform_indices = @transform_2, window_bounds = array<i64: 1, 1, 32>}, {transform_indices = @transform_3, window_bounds = array<i64: 1, 1, 32>}, {transform_indices = @transform_4, window_bounds = array<i64: 1, 32, 96>}, {transform_indices = @transform_5, window_bounds = array<i64: 1, 1, 96>}, {transform_indices = @transform_6, window_bounds = array<i64: 1, 32, 32>}, {transform_indices = @transform_7, window_bounds = array<i64: 1, 1, 32>}, {transform_indices = @transform_8, window_bounds = array<i64: 1, 1, 32>}, {transform_indices = @transform_9, window_bounds = array<i64: 1, 1, 32>}, {transform_indices = @transform_10, window_bounds = array<i64: 1, 32, 128>}, {transform_indices = @transform_11, window_bounds = array<i64: 1, 1, 128>}, {transform_indices = @transform_12, window_bounds = array<i64: 1, 128, 32>}, {transform_indices = @transform_13, window_bounds = array<i64: 1, 1, 32>}, {transform_indices = @transform_14, window_bounds = array<i64: 1, 16, 32>}]} {
    %c0_i32 = arith.constant 0 : i32
    %0 = arith.cmpi eq, %arg1, %c0_i32 : i32
    %1 = arith.extui %0 : i1 to i32
    %c0_i32_0 = arith.constant 0 : i32
    %2 = arith.cmpi ne, %1, %c0_i32_0 : i32
    scf.if %2 {
      %c0_86 = arith.constant 0 : index
      %c0_87 = arith.constant 0 : index
      %c0_88 = arith.constant 0 : index
      %223 = vector.load %arg2[%c0_86, %c0_87, %c0_88] : memref<1x16x32xf32, #tpu.memory_space<vmem>>, vector<1x16x32xf32>
      %224 = vector.shape_cast %223 : vector<1x16x32xf32> to vector<16x32xf32>
      %c0_89 = arith.constant 0 : index
      %c0_90 = arith.constant 0 : index
      %c0_91 = arith.constant 0 : index
      %225 = vector.load %arg16[%c0_89, %c0_90, %c0_91] : memref<1x16x32xf32, #tpu.memory_space<vmem>>, vector<1x16x32xf32>
      %226 = vector.shape_cast %225 : vector<1x16x32xf32> to vector<16x32xf32>
      %227 = vector.shape_cast %224 : vector<16x32xf32> to vector<1x16x32xf32>
      tpu.vector_store %arg16[%c0_89, %c0_90, %c0_91], %227 {strides = array<i32>} : memref<1x16x32xf32, #tpu.memory_space<vmem>>, vector<1x16x32xf32>,
    } else {
    }
    %c0 = arith.constant 0 : index
    %c0_1 = arith.constant 0 : index
    %c0_2 = arith.constant 0 : index
    %3 = vector.load %arg16[%c0, %c0_1, %c0_2] : memref<1x16x32xf32, #tpu.memory_space<vmem>>, vector<1x16x32xf32>
    %4 = vector.shape_cast %3 : vector<1x16x32xf32> to vector<16x32xf32>
    %c0_3 = arith.constant 0 : index
    %c0_4 = arith.constant 0 : index
    %5 = vector.load %arg3[%c0_3, %c0_4] : memref<8x8xf32, #tpu.memory_space<vmem>>, vector<8x8xf32>
    %c0_5 = arith.constant 0 : index
    %c0_6 = arith.constant 0 : index
    %c0_7 = arith.constant 0 : index
    %6 = vector.load %arg4[%c0_5, %c0_6, %c0_7] : memref<1x1x32xf32, #tpu.memory_space<vmem>>, vector<1x1x32xf32>
    %7 = vector.shape_cast %6 : vector<1x1x32xf32> to vector<1x32xf32>
    %c0_8 = arith.constant 0 : index
    %c0_9 = arith.constant 0 : index
    %c0_10 = arith.constant 0 : index
    %8 = vector.load %arg5[%c0_8, %c0_9, %c0_10] : memref<1x1x32xf32, #tpu.memory_space<vmem>>, vector<1x1x32xf32>
    %9 = vector.shape_cast %8 : vector<1x1x32xf32> to vector<1x32xf32>
    %cst = arith.constant dense<0.000000e+00> : vector<16xf32>
    %10 = vector.multi_reduction <add>, %4, %cst [1] : vector<16x32xf32> to vector<16xf32>
    %11 = vector.shape_cast %10 : vector<16xf32> to vector<16x1xf32>
    %cst_11 = arith.constant 3.200000e+01 : f32
    %12 = vector.broadcast %cst_11 : f32 to vector<16x1xf32>
    %13 = arith.divf %11, %12 : vector<16x1xf32>
    %14 = vector.broadcast %13 : vector<16x1xf32> to vector<16x32xf32>
    %15 = arith.subf %4, %14 : vector<16x32xf32>
    %16 = arith.mulf %15, %15 : vector<16x32xf32>
    %cst_12 = arith.constant dense<0.000000e+00> : vector<16xf32>
    %17 = vector.multi_reduction <add>, %16, %cst_12 [1] : vector<16x32xf32> to vector<16xf32>
    %18 = vector.shape_cast %17 : vector<16xf32> to vector<16x1xf32>
    %cst_13 = arith.constant 3.200000e+01 : f32
    %19 = vector.broadcast %cst_13 : f32 to vector<16x1xf32>
    %20 = arith.divf %18, %19 : vector<16x1xf32>
    %21 = vector.broadcast %13 : vector<16x1xf32> to vector<16x32xf32>
    %22 = arith.subf %4, %21 : vector<16x32xf32>
    %cst_14 = arith.constant 9.99999974E-6 : f32
    %23 = vector.broadcast %cst_14 : f32 to vector<16x1xf32>
    %24 = arith.addf %20, %23 : vector<16x1xf32>
    %25 = math.rsqrt %24 : vector<16x1xf32>
    %26 = vector.broadcast %25 : vector<16x1xf32> to vector<16x32xf32>
    %27 = arith.mulf %22, %26 : vector<16x32xf32>
    %28 = vector.broadcast %7 : vector<1x32xf32> to vector<16x32xf32>
    %29 = arith.mulf %27, %28 : vector<16x32xf32>
    %30 = vector.broadcast %9 : vector<1x32xf32> to vector<16x32xf32>
    %31 = arith.addf %29, %30 : vector<16x32xf32>
    %32 = arith.truncf %31 : vector<16x32xf32> to vector<16x32xbf16>
    %c0_15 = arith.constant 0 : index
    %c0_16 = arith.constant 0 : index
    %c0_17 = arith.constant 0 : index
    %33 = vector.load %arg6[%c0_15, %c0_16, %c0_17] : memref<1x32x96xbf16, #tpu.memory_space<vmem>>, vector<1x32x96xbf16>
    %34 = vector.shape_cast %33 : vector<1x32x96xbf16> to vector<32x96xbf16>
    %cst_18 = arith.constant dense<0.000000e+00> : vector<16x96xf32>
    %35 = tpu.matmul %32, %34, %cst_18 {dimension_numbers = #tpu.dot_dimension_numbers<[1], [0], [0], [1], [0, 0, 1, 1], [], []>} : vector<16x32xbf16>, vector<32x96xbf16>, vector<16x96xf32> -> vector<16x96xf32>
    %c0_19 = arith.constant 0 : index
    %c0_20 = arith.constant 0 : index
    %c0_21 = arith.constant 0 : index
    %36 = vector.load %arg7[%c0_19, %c0_20, %c0_21] : memref<1x1x96xf32, #tpu.memory_space<vmem>>, vector<1x1x96xf32>
    %37 = vector.shape_cast %36 : vector<1x1x96xf32> to vector<1x96xf32>
    %38 = vector.broadcast %37 : vector<1x96xf32> to vector<16x96xf32>
    %39 = arith.addf %35, %38 : vector<16x96xf32>
    %40 = vector.extract_strided_slice %39 {offsets = [0, 0], sizes = [16, 8], strides = [1, 1]} : vector<16x96xf32> to vector<16x8xf32>
    %41 = vector.shape_cast %40 : vector<16x8xf32> to vector<2x8x8xf32>
    %42 = arith.truncf %41 : vector<2x8x8xf32> to vector<2x8x8xbf16>
    %43 = vector.extract_strided_slice %39 {offsets = [0, 32], sizes = [16, 8], strides = [1, 1]} : vector<16x96xf32> to vector<16x8xf32>
    %44 = vector.shape_cast %43 : vector<16x8xf32> to vector<2x8x8xf32>
    %45 = arith.truncf %44 : vector<2x8x8xf32> to vector<2x8x8xbf16>
    %46 = vector.extract_strided_slice %39 {offsets = [0, 64], sizes = [16, 8], strides = [1, 1]} : vector<16x96xf32> to vector<16x8xf32>
    %47 = vector.shape_cast %46 : vector<16x8xf32> to vector<2x8x8xf32>
    %48 = arith.truncf %47 : vector<2x8x8xf32> to vector<2x8x8xbf16>
    "tpu.trace_start"() <{level = 10 : i32, message = "bqd,bkd->bqk"}> : () -> ()
    %cst_22 = arith.constant dense<0.000000e+00> : vector<2x8x8xf32>
    %49 = tpu.matmul %42, %45, %cst_22 {dimension_numbers = #tpu.dot_dimension_numbers<[2], [2], [1], [1], [0, 0, 0, 1, 1, 1], [0], [0]>} : vector<2x8x8xbf16>, vector<2x8x8xbf16>, vector<2x8x8xf32> -> vector<2x8x8xf32>
    "tpu.trace_stop"() : () -> ()
    %cst_23 = arith.constant 0.353553385 : f32
    %50 = vector.broadcast %cst_23 : f32 to vector<2x8x8xf32>
    %51 = arith.mulf %49, %50 : vector<2x8x8xf32>
    %52 = vector.shape_cast %5 : vector<8x8xf32> to vector<1x8x8xf32>
    %53 = vector.broadcast %52 : vector<1x8x8xf32> to vector<2x8x8xf32>
    %54 = arith.addf %51, %53 : vector<2x8x8xf32>
    %cst_24 = arith.constant dense<0xFF800000> : vector<2x8xf32>
    %55 = vector.multi_reduction <maximumf>, %54, %cst_24 [2] : vector<2x8x8xf32> to vector<2x8xf32>
    %56 = vector.shape_cast %55 : vector<2x8xf32> to vector<2x8x1xf32>
    %57 = vector.broadcast %56 : vector<2x8x1xf32> to vector<2x8x8xf32>
    %58 = arith.subf %54, %57 : vector<2x8x8xf32>
    %59 = math.exp %58 : vector<2x8x8xf32>
    %cst_25 = arith.constant dense<0.000000e+00> : vector<2x8xf32>
    %60 = vector.multi_reduction <add>, %59, %cst_25 [2] : vector<2x8x8xf32> to vector<2x8xf32>
    %61 = vector.shape_cast %60 : vector<2x8xf32> to vector<2x8x1xf32>
    %62 = tpu.reciprocal %61 {approx = true} : vector<2x8x1xf32> -> vector<2x8x1xf32>
    %63 = arith.truncf %59 : vector<2x8x8xf32> to vector<2x8x8xbf16>
    "tpu.trace_start"() <{level = 10 : i32, message = "bqk,bkd->bqd"}> : () -> ()
    %cst_26 = arith.constant dense<0.000000e+00> : vector<2x8x8xf32>
    %64 = tpu.matmul %63, %48, %cst_26 {dimension_numbers = #tpu.dot_dimension_numbers<[2], [1], [1], [2], [0, 0, 0, 1, 1, 2], [0], [0]>} : vector<2x8x8xbf16>, vector<2x8x8xbf16>, vector<2x8x8xf32> -> vector<2x8x8xf32>
    "tpu.trace_stop"() : () -> ()
    %65 = vector.broadcast %62 : vector<2x8x1xf32> to vector<2x8x8xf32>
    %66 = arith.mulf %64, %65 : vector<2x8x8xf32>
    %67 = vector.shape_cast %66 : vector<2x8x8xf32> to vector<16x8xf32>
    %68 = arith.truncf %67 : vector<16x8xf32> to vector<16x8xbf16>
    %c0_27 = arith.constant 0 : index
    %c0_28 = arith.constant 0 : index
    %69 = vector.load %arg17[%c0_27, %c0_28] : memref<16x32xbf16, #tpu.memory_space<vmem>>, vector<16x8xbf16>
    tpu.vector_store %arg17[%c0_27, %c0_28], %68 {strides = array<i32>} : memref<16x32xbf16, #tpu.memory_space<vmem>>, vector<16x8xbf16>,
    %70 = vector.extract_strided_slice %39 {offsets = [0, 8], sizes = [16, 8], strides = [1, 1]} : vector<16x96xf32> to vector<16x8xf32>
    %71 = vector.shape_cast %70 : vector<16x8xf32> to vector<2x8x8xf32>
    %72 = arith.truncf %71 : vector<2x8x8xf32> to vector<2x8x8xbf16>
    %73 = vector.extract_strided_slice %39 {offsets = [0, 40], sizes = [16, 8], strides = [1, 1]} : vector<16x96xf32> to vector<16x8xf32>
    %74 = vector.shape_cast %73 : vector<16x8xf32> to vector<2x8x8xf32>
    %75 = arith.truncf %74 : vector<2x8x8xf32> to vector<2x8x8xbf16>
    %76 = vector.extract_strided_slice %39 {offsets = [0, 72], sizes = [16, 8], strides = [1, 1]} : vector<16x96xf32> to vector<16x8xf32>
    %77 = vector.shape_cast %76 : vector<16x8xf32> to vector<2x8x8xf32>
    %78 = arith.truncf %77 : vector<2x8x8xf32> to vector<2x8x8xbf16>
    "tpu.trace_start"() <{level = 10 : i32, message = "bqd,bkd->bqk"}> : () -> ()
    %cst_29 = arith.constant dense<0.000000e+00> : vector<2x8x8xf32>
    %79 = tpu.matmul %72, %75, %cst_29 {dimension_numbers = #tpu.dot_dimension_numbers<[2], [2], [1], [1], [0, 0, 0, 1, 1, 1], [0], [0]>} : vector<2x8x8xbf16>, vector<2x8x8xbf16>, vector<2x8x8xf32> -> vector<2x8x8xf32>
    "tpu.trace_stop"() : () -> ()
    %cst_30 = arith.constant 0.353553385 : f32
    %80 = vector.broadcast %cst_30 : f32 to vector<2x8x8xf32>
    %81 = arith.mulf %79, %80 : vector<2x8x8xf32>
    %82 = vector.shape_cast %5 : vector<8x8xf32> to vector<1x8x8xf32>
    %83 = vector.broadcast %82 : vector<1x8x8xf32> to vector<2x8x8xf32>
    %84 = arith.addf %81, %83 : vector<2x8x8xf32>
    %cst_31 = arith.constant dense<0xFF800000> : vector<2x8xf32>
    %85 = vector.multi_reduction <maximumf>, %84, %cst_31 [2] : vector<2x8x8xf32> to vector<2x8xf32>
    %86 = vector.shape_cast %85 : vector<2x8xf32> to vector<2x8x1xf32>
    %87 = vector.broadcast %86 : vector<2x8x1xf32> to vector<2x8x8xf32>
    %88 = arith.subf %84, %87 : vector<2x8x8xf32>
    %89 = math.exp %88 : vector<2x8x8xf32>
    %cst_32 = arith.constant dense<0.000000e+00> : vector<2x8xf32>
    %90 = vector.multi_reduction <add>, %89, %cst_32 [2] : vector<2x8x8xf32> to vector<2x8xf32>
    %91 = vector.shape_cast %90 : vector<2x8xf32> to vector<2x8x1xf32>
    %92 = tpu.reciprocal %91 {approx = true} : vector<2x8x1xf32> -> vector<2x8x1xf32>
    %93 = arith.truncf %89 : vector<2x8x8xf32> to vector<2x8x8xbf16>
    "tpu.trace_start"() <{level = 10 : i32, message = "bqk,bkd->bqd"}> : () -> ()
    %cst_33 = arith.constant dense<0.000000e+00> : vector<2x8x8xf32>
    %94 = tpu.matmul %93, %78, %cst_33 {dimension_numbers = #tpu.dot_dimension_numbers<[2], [1], [1], [2], [0, 0, 0, 1, 1, 2], [0], [0]>} : vector<2x8x8xbf16>, vector<2x8x8xbf16>, vector<2x8x8xf32> -> vector<2x8x8xf32>
    "tpu.trace_stop"() : () -> ()
    %95 = vector.broadcast %92 : vector<2x8x1xf32> to vector<2x8x8xf32>
    %96 = arith.mulf %94, %95 : vector<2x8x8xf32>
    %97 = vector.shape_cast %96 : vector<2x8x8xf32> to vector<16x8xf32>
    %98 = arith.truncf %97 : vector<16x8xf32> to vector<16x8xbf16>
    %c0_34 = arith.constant 0 : index
    %c8 = arith.constant 8 : index
    %99 = vector.load %arg17[%c0_34, %c8] : memref<16x32xbf16, #tpu.memory_space<vmem>>, vector<16x8xbf16>
    tpu.vector_store %arg17[%c0_34, %c8], %98 {strides = array<i32>} : memref<16x32xbf16, #tpu.memory_space<vmem>>, vector<16x8xbf16>,
    %100 = vector.extract_strided_slice %39 {offsets = [0, 16], sizes = [16, 8], strides = [1, 1]} : vector<16x96xf32> to vector<16x8xf32>
    %101 = vector.shape_cast %100 : vector<16x8xf32> to vector<2x8x8xf32>
    %102 = arith.truncf %101 : vector<2x8x8xf32> to vector<2x8x8xbf16>
    %103 = vector.extract_strided_slice %39 {offsets = [0, 48], sizes = [16, 8], strides = [1, 1]} : vector<16x96xf32> to vector<16x8xf32>
    %104 = vector.shape_cast %103 : vector<16x8xf32> to vector<2x8x8xf32>
    %105 = arith.truncf %104 : vector<2x8x8xf32> to vector<2x8x8xbf16>
    %106 = vector.extract_strided_slice %39 {offsets = [0, 80], sizes = [16, 8], strides = [1, 1]} : vector<16x96xf32> to vector<16x8xf32>
    %107 = vector.shape_cast %106 : vector<16x8xf32> to vector<2x8x8xf32>
    %108 = arith.truncf %107 : vector<2x8x8xf32> to vector<2x8x8xbf16>
    "tpu.trace_start"() <{level = 10 : i32, message = "bqd,bkd->bqk"}> : () -> ()
    %cst_35 = arith.constant dense<0.000000e+00> : vector<2x8x8xf32>
    %109 = tpu.matmul %102, %105, %cst_35 {dimension_numbers = #tpu.dot_dimension_numbers<[2], [2], [1], [1], [0, 0, 0, 1, 1, 1], [0], [0]>} : vector<2x8x8xbf16>, vector<2x8x8xbf16>, vector<2x8x8xf32> -> vector<2x8x8xf32>
    "tpu.trace_stop"() : () -> ()
    %cst_36 = arith.constant 0.353553385 : f32
    %110 = vector.broadcast %cst_36 : f32 to vector<2x8x8xf32>
    %111 = arith.mulf %109, %110 : vector<2x8x8xf32>
    %112 = vector.shape_cast %5 : vector<8x8xf32> to vector<1x8x8xf32>
    %113 = vector.broadcast %112 : vector<1x8x8xf32> to vector<2x8x8xf32>
    %114 = arith.addf %111, %113 : vector<2x8x8xf32>
    %cst_37 = arith.constant dense<0xFF800000> : vector<2x8xf32>
    %115 = vector.multi_reduction <maximumf>, %114, %cst_37 [2] : vector<2x8x8xf32> to vector<2x8xf32>
    %116 = vector.shape_cast %115 : vector<2x8xf32> to vector<2x8x1xf32>
    %117 = vector.broadcast %116 : vector<2x8x1xf32> to vector<2x8x8xf32>
    %118 = arith.subf %114, %117 : vector<2x8x8xf32>
    %119 = math.exp %118 : vector<2x8x8xf32>
    %cst_38 = arith.constant dense<0.000000e+00> : vector<2x8xf32>
    %120 = vector.multi_reduction <add>, %119, %cst_38 [2] : vector<2x8x8xf32> to vector<2x8xf32>
    %121 = vector.shape_cast %120 : vector<2x8xf32> to vector<2x8x1xf32>
    %122 = tpu.reciprocal %121 {approx = true} : vector<2x8x1xf32> -> vector<2x8x1xf32>
    %123 = arith.truncf %119 : vector<2x8x8xf32> to vector<2x8x8xbf16>
    "tpu.trace_start"() <{level = 10 : i32, message = "bqk,bkd->bqd"}> : () -> ()
    %cst_39 = arith.constant dense<0.000000e+00> : vector<2x8x8xf32>
    %124 = tpu.matmul %123, %108, %cst_39 {dimension_numbers = #tpu.dot_dimension_numbers<[2], [1], [1], [2], [0, 0, 0, 1, 1, 2], [0], [0]>} : vector<2x8x8xbf16>, vector<2x8x8xbf16>, vector<2x8x8xf32> -> vector<2x8x8xf32>
    "tpu.trace_stop"() : () -> ()
    %125 = vector.broadcast %122 : vector<2x8x1xf32> to vector<2x8x8xf32>
    %126 = arith.mulf %124, %125 : vector<2x8x8xf32>
    %127 = vector.shape_cast %126 : vector<2x8x8xf32> to vector<16x8xf32>
    %128 = arith.truncf %127 : vector<16x8xf32> to vector<16x8xbf16>
    %c0_40 = arith.constant 0 : index
    %c16 = arith.constant 16 : index
    %129 = vector.load %arg17[%c0_40, %c16] : memref<16x32xbf16, #tpu.memory_space<vmem>>, vector<16x8xbf16>
    tpu.vector_store %arg17[%c0_40, %c16], %128 {strides = array<i32>} : memref<16x32xbf16, #tpu.memory_space<vmem>>, vector<16x8xbf16>,
    %130 = vector.extract_strided_slice %39 {offsets = [0, 24], sizes = [16, 8], strides = [1, 1]} : vector<16x96xf32> to vector<16x8xf32>
    %131 = vector.shape_cast %130 : vector<16x8xf32> to vector<2x8x8xf32>
    %132 = arith.truncf %131 : vector<2x8x8xf32> to vector<2x8x8xbf16>
    %133 = vector.extract_strided_slice %39 {offsets = [0, 56], sizes = [16, 8], strides = [1, 1]} : vector<16x96xf32> to vector<16x8xf32>
    %134 = vector.shape_cast %133 : vector<16x8xf32> to vector<2x8x8xf32>
    %135 = arith.truncf %134 : vector<2x8x8xf32> to vector<2x8x8xbf16>
    %136 = vector.extract_strided_slice %39 {offsets = [0, 88], sizes = [16, 8], strides = [1, 1]} : vector<16x96xf32> to vector<16x8xf32>
    %137 = vector.shape_cast %136 : vector<16x8xf32> to vector<2x8x8xf32>
    %138 = arith.truncf %137 : vector<2x8x8xf32> to vector<2x8x8xbf16>
    "tpu.trace_start"() <{level = 10 : i32, message = "bqd,bkd->bqk"}> : () -> ()
    %cst_41 = arith.constant dense<0.000000e+00> : vector<2x8x8xf32>
    %139 = tpu.matmul %132, %135, %cst_41 {dimension_numbers = #tpu.dot_dimension_numbers<[2], [2], [1], [1], [0, 0, 0, 1, 1, 1], [0], [0]>} : vector<2x8x8xbf16>, vector<2x8x8xbf16>, vector<2x8x8xf32> -> vector<2x8x8xf32>
    "tpu.trace_stop"() : () -> ()
    %cst_42 = arith.constant 0.353553385 : f32
    %140 = vector.broadcast %cst_42 : f32 to vector<2x8x8xf32>
    %141 = arith.mulf %139, %140 : vector<2x8x8xf32>
    %142 = vector.shape_cast %5 : vector<8x8xf32> to vector<1x8x8xf32>
    %143 = vector.broadcast %142 : vector<1x8x8xf32> to vector<2x8x8xf32>
    %144 = arith.addf %141, %143 : vector<2x8x8xf32>
    %cst_43 = arith.constant dense<0xFF800000> : vector<2x8xf32>
    %145 = vector.multi_reduction <maximumf>, %144, %cst_43 [2] : vector<2x8x8xf32> to vector<2x8xf32>
    %146 = vector.shape_cast %145 : vector<2x8xf32> to vector<2x8x1xf32>
    %147 = vector.broadcast %146 : vector<2x8x1xf32> to vector<2x8x8xf32>
    %148 = arith.subf %144, %147 : vector<2x8x8xf32>
    %149 = math.exp %148 : vector<2x8x8xf32>
    %cst_44 = arith.constant dense<0.000000e+00> : vector<2x8xf32>
    %150 = vector.multi_reduction <add>, %149, %cst_44 [2] : vector<2x8x8xf32> to vector<2x8xf32>
    %151 = vector.shape_cast %150 : vector<2x8xf32> to vector<2x8x1xf32>
    %152 = tpu.reciprocal %151 {approx = true} : vector<2x8x1xf32> -> vector<2x8x1xf32>
    %153 = arith.truncf %149 : vector<2x8x8xf32> to vector<2x8x8xbf16>
    "tpu.trace_start"() <{level = 10 : i32, message = "bqk,bkd->bqd"}> : () -> ()
    %cst_45 = arith.constant dense<0.000000e+00> : vector<2x8x8xf32>
    %154 = tpu.matmul %153, %138, %cst_45 {dimension_numbers = #tpu.dot_dimension_numbers<[2], [1], [1], [2], [0, 0, 0, 1, 1, 2], [0], [0]>} : vector<2x8x8xbf16>, vector<2x8x8xbf16>, vector<2x8x8xf32> -> vector<2x8x8xf32>
    "tpu.trace_stop"() : () -> ()
    %155 = vector.broadcast %152 : vector<2x8x1xf32> to vector<2x8x8xf32>
    %156 = arith.mulf %154, %155 : vector<2x8x8xf32>
    %157 = vector.shape_cast %156 : vector<2x8x8xf32> to vector<16x8xf32>
    %158 = arith.truncf %157 : vector<16x8xf32> to vector<16x8xbf16>
    %c0_46 = arith.constant 0 : index
    %c24 = arith.constant 24 : index
    %159 = vector.load %arg17[%c0_46, %c24] : memref<16x32xbf16, #tpu.memory_space<vmem>>, vector<16x8xbf16>
    tpu.vector_store %arg17[%c0_46, %c24], %158 {strides = array<i32>} : memref<16x32xbf16, #tpu.memory_space<vmem>>, vector<16x8xbf16>,
    %c0_47 = arith.constant 0 : index
    %c0_48 = arith.constant 0 : index
    %160 = vector.load %arg17[%c0_47, %c0_48] : memref<16x32xbf16, #tpu.memory_space<vmem>>, vector<16x32xbf16>
    %c0_49 = arith.constant 0 : index
    %c0_50 = arith.constant 0 : index
    %c0_51 = arith.constant 0 : index
    %161 = vector.load %arg8[%c0_49, %c0_50, %c0_51] : memref<1x32x32xbf16, #tpu.memory_space<vmem>>, vector<1x32x32xbf16>
    %162 = vector.shape_cast %161 : vector<1x32x32xbf16> to vector<32x32xbf16>
    %cst_52 = arith.constant dense<0.000000e+00> : vector<16x32xf32>
    %163 = tpu.matmul %160, %162, %cst_52 {dimension_numbers = #tpu.dot_dimension_numbers<[1], [0], [0], [1], [0, 0, 1, 1], [], []>} : vector<16x32xbf16>, vector<32x32xbf16>, vector<16x32xf32> -> vector<16x32xf32>
    %c0_53 = arith.constant 0 : index
    %c0_54 = arith.constant 0 : index
    %c0_55 = arith.constant 0 : index
    %164 = vector.load %arg9[%c0_53, %c0_54, %c0_55] : memref<1x1x32xf32, #tpu.memory_space<vmem>>, vector<1x1x32xf32>
    %165 = vector.shape_cast %164 : vector<1x1x32xf32> to vector<1x32xf32>
    %166 = vector.broadcast %165 : vector<1x32xf32> to vector<16x32xf32>
    %167 = arith.addf %163, %166 : vector<16x32xf32>
    %168 = arith.addf %4, %167 : vector<16x32xf32>
    %c0_56 = arith.constant 0 : index
    %c0_57 = arith.constant 0 : index
    %c0_58 = arith.constant 0 : index
    %169 = vector.load %arg10[%c0_56, %c0_57, %c0_58] : memref<1x1x32xf32, #tpu.memory_space<vmem>>, vector<1x1x32xf32>
    %170 = vector.shape_cast %169 : vector<1x1x32xf32> to vector<1x32xf32>
    %c0_59 = arith.constant 0 : index
    %c0_60 = arith.constant 0 : index
    %c0_61 = arith.constant 0 : index
    %171 = vector.load %arg11[%c0_59, %c0_60, %c0_61] : memref<1x1x32xf32, #tpu.memory_space<vmem>>, vector<1x1x32xf32>
    %172 = vector.shape_cast %171 : vector<1x1x32xf32> to vector<1x32xf32>
    %cst_62 = arith.constant dense<0.000000e+00> : vector<16xf32>
    %173 = vector.multi_reduction <add>, %168, %cst_62 [1] : vector<16x32xf32> to vector<16xf32>
    %174 = vector.shape_cast %173 : vector<16xf32> to vector<16x1xf32>
    %cst_63 = arith.constant 3.200000e+01 : f32
    %175 = vector.broadcast %cst_63 : f32 to vector<16x1xf32>
    %176 = arith.divf %174, %175 : vector<16x1xf32>
    %177 = vector.broadcast %176 : vector<16x1xf32> to vector<16x32xf32>
    %178 = arith.subf %168, %177 : vector<16x32xf32>
    %179 = arith.mulf %178, %178 : vector<16x32xf32>
    %cst_64 = arith.constant dense<0.000000e+00> : vector<16xf32>
    %180 = vector.multi_reduction <add>, %179, %cst_64 [1] : vector<16x32xf32> to vector<16xf32>
    %181 = vector.shape_cast %180 : vector<16xf32> to vector<16x1xf32>
    %cst_65 = arith.constant 3.200000e+01 : f32
    %182 = vector.broadcast %cst_65 : f32 to vector<16x1xf32>
    %183 = arith.divf %181, %182 : vector<16x1xf32>
    %184 = vector.broadcast %176 : vector<16x1xf32> to vector<16x32xf32>
    %185 = arith.subf %168, %184 : vector<16x32xf32>
    %cst_66 = arith.constant 9.99999974E-6 : f32
    %186 = vector.broadcast %cst_66 : f32 to vector<16x1xf32>
    %187 = arith.addf %183, %186 : vector<16x1xf32>
    %188 = math.rsqrt %187 : vector<16x1xf32>
    %189 = vector.broadcast %188 : vector<16x1xf32> to vector<16x32xf32>
    %190 = arith.mulf %185, %189 : vector<16x32xf32>
    %191 = vector.broadcast %170 : vector<1x32xf32> to vector<16x32xf32>
    %192 = arith.mulf %190, %191 : vector<16x32xf32>
    %193 = vector.broadcast %172 : vector<1x32xf32> to vector<16x32xf32>
    %194 = arith.addf %192, %193 : vector<16x32xf32>
    %195 = arith.truncf %194 : vector<16x32xf32> to vector<16x32xbf16>
    %c0_67 = arith.constant 0 : index
    %c0_68 = arith.constant 0 : index
    %c0_69 = arith.constant 0 : index
    %196 = vector.load %arg12[%c0_67, %c0_68, %c0_69] : memref<1x32x128xbf16, #tpu.memory_space<vmem>>, vector<1x32x128xbf16>
    %197 = vector.shape_cast %196 : vector<1x32x128xbf16> to vector<32x128xbf16>
    %cst_70 = arith.constant dense<0.000000e+00> : vector<16x128xf32>
    %198 = tpu.matmul %195, %197, %cst_70 {dimension_numbers = #tpu.dot_dimension_numbers<[1], [0], [0], [1], [0, 0, 1, 1], [], []>} : vector<16x32xbf16>, vector<32x128xbf16>, vector<16x128xf32> -> vector<16x128xf32>
    %c0_71 = arith.constant 0 : index
    %c0_72 = arith.constant 0 : index
    %c0_73 = arith.constant 0 : index
    %199 = vector.load %arg13[%c0_71, %c0_72, %c0_73] : memref<1x1x128xf32, #tpu.memory_space<vmem>>, vector<1x1x128xf32>
    %200 = vector.shape_cast %199 : vector<1x1x128xf32> to vector<1x128xf32>
    %201 = vector.broadcast %200 : vector<1x128xf32> to vector<16x128xf32>
    %202 = arith.addf %198, %201 : vector<16x128xf32>
    %cst_74 = arith.constant 1.702000e+00 : f32
    %203 = vector.broadcast %cst_74 : f32 to vector<16x128xf32>
    %204 = arith.mulf %203, %202 : vector<16x128xf32>
    %205 = arith.negf %204 : vector<16x128xf32>
    %206 = math.exp %205 : vector<16x128xf32>
    %cst_75 = arith.constant 1.000000e+00 : f32
    %207 = vector.broadcast %cst_75 : f32 to vector<16x128xf32>
    %208 = arith.addf %207, %206 : vector<16x128xf32>
    %209 = arith.divf %207, %208 : vector<16x128xf32>
    %210 = arith.mulf %202, %209 : vector<16x128xf32>
    %211 = arith.truncf %210 : vector<16x128xf32> to vector<16x128xbf16>
    %c0_76 = arith.constant 0 : index
    %c0_77 = arith.constant 0 : index
    %c0_78 = arith.constant 0 : index
    %212 = vector.load %arg14[%c0_76, %c0_77, %c0_78] : memref<1x128x32xbf16, #tpu.memory_space<vmem>>, vector<1x128x32xbf16>
    %213 = vector.shape_cast %212 : vector<1x128x32xbf16> to vector<128x32xbf16>
    %cst_79 = arith.constant dense<0.000000e+00> : vector<16x32xf32>
    %214 = tpu.matmul %211, %213, %cst_79 {dimension_numbers = #tpu.dot_dimension_numbers<[1], [0], [0], [1], [0, 0, 1, 1], [], []>} : vector<16x128xbf16>, vector<128x32xbf16>, vector<16x32xf32> -> vector<16x32xf32>
    %c0_80 = arith.constant 0 : index
    %c0_81 = arith.constant 0 : index
    %c0_82 = arith.constant 0 : index
    %215 = vector.load %arg15[%c0_80, %c0_81, %c0_82] : memref<1x1x32xf32, #tpu.memory_space<vmem>>, vector<1x1x32xf32>
    %216 = vector.shape_cast %215 : vector<1x1x32xf32> to vector<1x32xf32>
    %217 = vector.broadcast %216 : vector<1x32xf32> to vector<16x32xf32>
    %218 = arith.addf %214, %217 : vector<16x32xf32>
    %219 = arith.addf %168, %218 : vector<16x32xf32>
    %c0_83 = arith.constant 0 : index
    %c0_84 = arith.constant 0 : index
    %c0_85 = arith.constant 0 : index
    %220 = vector.load %arg16[%c0_83, %c0_84, %c0_85] : memref<1x16x32xf32, #tpu.memory_space<vmem>>, vector<1x16x32xf32>
    %221 = vector.shape_cast %220 : vector<1x16x32xf32> to vector<16x32xf32>
    %222 = vector.shape_cast %219 : vector<16x32xf32> to vector<1x16x32xf32>
    tpu.vector_store %arg16[%c0_83, %c0_84, %c0_85], %222 {strides = array<i32>} : memref<1x16x32xf32, #tpu.memory_space<vmem>>, vector<1x16x32xf32>,
    return
  }
  func.func @transform_0(%arg0: i32, %arg1: i32) -> (i32, i32, i32) {
    %c0_i32 = arith.constant 0 : i32
    %c0_i32_0 = arith.constant 0 : i32
    %c0_i32_1 = arith.constant 0 : i32
    return %arg0, %c0_i32, %c0_i32_0 : i32, i32, i32
  }
  func.func @transform_1(%arg0: i32, %arg1: i32) -> (i32, i32) {
    %c0_i32 = arith.constant 0 : i32
    %c0_i32_0 = arith.constant 0 : i32
    %c0_i32_1 = arith.constant 0 : i32
    return %c0_i32, %c0_i32_0 : i32, i32
  }
  func.func @transform_2(%arg0: i32, %arg1: i32) -> (i32, i32, i32) {
    %c0_i32 = arith.constant 0 : i32
    %c0_i32_0 = arith.constant 0 : i32
    %c0_i32_1 = arith.constant 0 : i32
    return %arg1, %c0_i32, %c0_i32_0 : i32, i32, i32
  }
  func.func @transform_3(%arg0: i32, %arg1: i32) -> (i32, i32, i32) {
    %c0_i32 = arith.constant 0 : i32
    %c0_i32_0 = arith.constant 0 : i32
    %c0_i32_1 = arith.constant 0 : i32
    return %arg1, %c0_i32, %c0_i32_0 : i32, i32, i32
  }
  func.func @transform_4(%arg0: i32, %arg1: i32) -> (i32, i32, i32) {
    %c0_i32 = arith.constant 0 : i32
    %c0_i32_0 = arith.constant 0 : i32
    %c0_i32_1 = arith.constant 0 : i32
    return %arg1, %c0_i32, %c0_i32_0 : i32, i32, i32
  }
  func.func @transform_5(%arg0: i32, %arg1: i32) -> (i32, i32, i32) {
    %c0_i32 = arith.constant 0 : i32
    %c0_i32_0 = arith.constant 0 : i32
    %c0_i32_1 = arith.constant 0 : i32
    return %arg1, %c0_i32, %c0_i32_0 : i32, i32, i32
  }
  func.func @transform_6(%arg0: i32, %arg1: i32) -> (i32, i32, i32) {
    %c0_i32 = arith.constant 0 : i32
    %c0_i32_0 = arith.constant 0 : i32
    %c0_i32_1 = arith.constant 0 : i32
    return %arg1, %c0_i32, %c0_i32_0 : i32, i32, i32
  }
  func.func @transform_7(%arg0: i32, %arg1: i32) -> (i32, i32, i32) {
    %c0_i32 = arith.constant 0 : i32
    %c0_i32_0 = arith.constant 0 : i32
    %c0_i32_1 = arith.constant 0 : i32
    return %arg1, %c0_i32, %c0_i32_0 : i32, i32, i32
  }
  func.func @transform_8(%arg0: i32, %arg1: i32) -> (i32, i32, i32) {
    %c0_i32 = arith.constant 0 : i32
    %c0_i32_0 = arith.constant 0 : i32
    %c0_i32_1 = arith.constant 0 : i32
    return %arg1, %c0_i32, %c0_i32_0 : i32, i32, i32
  }
  func.func @transform_9(%arg0: i32, %arg1: i32) -> (i32, i32, i32) {
    %c0_i32 = arith.constant 0 : i32
    %c0_i32_0 = arith.constant 0 : i32
    %c0_i32_1 = arith.constant 0 : i32
    return %arg1, %c0_i32, %c0_i32_0 : i32, i32, i32
  }
  func.func @transform_10(%arg0: i32, %arg1: i32) -> (i32, i32, i32) {
    %c0_i32 = arith.constant 0 : i32
    %c0_i32_0 = arith.constant 0 : i32
    %c0_i32_1 = arith.constant 0 : i32
    return %arg1, %c0_i32, %c0_i32_0 : i32, i32, i32
  }
  func.func @transform_11(%arg0: i32, %arg1: i32) -> (i32, i32, i32) {
    %c0_i32 = arith.constant 0 : i32
    %c0_i32_0 = arith.constant 0 : i32
    %c0_i32_1 = arith.constant 0 : i32
    return %arg1, %c0_i32, %c0_i32_0 : i32, i32, i32
  }
  func.func @transform_12(%arg0: i32, %arg1: i32) -> (i32, i32, i32) {
    %c0_i32 = arith.constant 0 : i32
    %c0_i32_0 = arith.constant 0 : i32
    %c0_i32_1 = arith.constant 0 : i32
    return %arg1, %c0_i32, %c0_i32_0 : i32, i32, i32
  }
  func.func @transform_13(%arg0: i32, %arg1: i32) -> (i32, i32, i32) {
    %c0_i32 = arith.constant 0 : i32
    %c0_i32_0 = arith.constant 0 : i32
    %c0_i32_1 = arith.constant 0 : i32
    return %arg1, %c0_i32, %c0_i32_0 : i32, i32, i32
  }
  func.func @transform_14(%arg0: i32, %arg1: i32) -> (i32, i32, i32) {
    %c0_i32 = arith.constant 0 : i32
    %c0_i32_0 = arith.constant 0 : i32
    %c0_i32_1 = arith.constant 0 : i32
    return %arg0, %c0_i32, %c0_i32_0 : i32, i32, i32
  }
}

</mosaic_0001>

<bundles_post_ra>
// kernel: tpu_custom_call.1
= control target key start
LH: loop header
LB: loop body
LE: loop exit
PB: predicated region body
PF: predicated region fallthrough
CT: control target
= control target key end

     0   :  { %s3247_s0 = inlined_call_operand.hbm [shape: f32[1,16,32], index: 0, kind: input, shape index: {}, may-alias: {0,14}]   ;;  %s3248_s1 = inlined_call_operand.vmem [shape: f32[8,8], index: 1, kind: input, shape index: {}]   ;;  %s3249_s2 = inlined_call_operand.vmem [shape: f32[2,1,32], index: 2, kind: input, shape index: {}]   ;;  %s3250_s3 = inlined_call_operand.vmem [shape: f32[2,1,32], index: 3, kind: input, shape index: {}]   ;;  %s3251_s4 = inlined_call_operand.vmem [shape: bf16[2,32,96], index: 4, kind: input, shape index: {}]   ;;  %s3252_s5 = inlined_call_operand.vmem [shape: f32[2,1,96], index: 5, kind: input, shape index: {}]   ;;  %s3253_s6 = inlined_call_operand.vmem [shape: bf16[2,32,32], index: 6, kind: input, shape index: {}]   ;;  %s3254_s7 = inlined_call_operand.vmem [shape: f32[2,1,32], index: 7, kind: input, shape index: {}]   ;;  %s3255_s8 = inlined_call_operand.vmem [shape: f32[2,1,32], index: 8, kind: input, shape index: {}]   ;;  %s3256_s9 = inlined_call_operand.vmem [shape: f32[2,1,32], index: 9, kind: input, shape index: {}]   ;;  %s3257_s10 = inlined_call_operand.vmem [shape: bf16[2,32,128], index: 10, kind: input, shape index: {}]   ;;  %s3258_s11 = inlined_call_operand.vmem [shape: f32[2,1,128], index: 11, kind: input, shape index: {}]   ;;  %s3259_s12 = inlined_call_operand.vmem [shape: bf16[2,128,32], index: 12, kind: input, shape index: {}]   ;;  %s3260_s13 = inlined_call_operand.vmem [shape: f32[2,1,32], index: 13, kind: input, shape index: {}]   ;;  %s3261_s14 = inlined_call_operand.hbm [shape: f32[1,16,32], index: 14, kind: output, shape index: {}, may-alias: {0,14}]  }
   0x1   :  { %3266 = sst [smem:[#allocation13_spill]] %s3247_s0 }
   0x2   :  { %3267 = sst [smem:[#allocation14_spill]] %s3251_s4 }
   0x3   :  { %3268 = sst [smem:[#allocation15_spill]] %s3253_s6 }
   0x4   :  { %3269 = sst [smem:[#allocation16_spill]] %s3261_s14 }
   0x5   :  { %19 = vsyncpa [#allocation4], 0 }
   0x6   :  { %20 = vsyncpa [#allocation5], 0  ;;  %s2827_s29 = smov 0   ;;  %s2829_s30 = smov 0  }
   0x7   :  { %s2831_s15 = smov 0  }
   0x8 LB: > { %3270 = sst [smem:[#allocation9_spill]] %s2725_s30  ;;  %s3262_s16 = sadd.s32 4294967295, %s2729_s15   ;;  %s2729_s15 = sphi %s2831_s15, %s26_s15   ;;  %s2725_s30 = sphi %s2829_s30, %s3290_s30   ;;  %s2721_s29 = sphi %s2827_s29, %s3289_s29  }
   0x9   : > { %3271 = sst [smem:[#allocation10_spill]] %s2729_s15  ;;  %s35_s17 = sadd.s32 1, %s2725_s30 }
   0xa   : > { %p36_p0 = scmp.ge.s32.totalorder %s35_s17, 2  ;;  %p2253_p1 = scmp.ge.s32.totalorder %s2729_s15, 1 }
   0xb   : > { %p428_p2 = scmp.lt.s32.totalorder %s2729_s15, 3  ;;  %p2854_p4 = scmp.eq.s32.totalorder %s3262_s16, 0 }
   0xc   : > { %s3292_s17 = smov (%p36_p0, %s35_s17), 0  ;;  %s2731_s20 = smov [#allocation3]  }
   0xd   : > { %3272 = sst [smem:[#allocation11_spill]] %s3292_s17  ;;  %p2848_p3 = pnand %p2253_p1, %p428_p2 }
   0xe   : > { %s443_s21 = sshll.u32 %s2731_s20, 4  ;;  %s444_s21 = int_to_ptr.vmem [resolvable:$true] %s443_s21 }
   0xf   : > { %p2533_p5 = pneg %p2848_p3  ;;  %s2660_s22 = scalar_lea.vmem %s444_s21, 256 }
  0x10   : > { %p2661_p8 = scmp.ne.s32.totalorder %s444_s21, %s2660_s22  ;;  %p2668_p11 = scmp.lt.s32.totalorder %s444_s21, %s444_s21 }
  0x11   : > { %p2534_p6 = pnand %p2854_p4, %p2533_p5  ;;  %p2669_p12 = scmp.lt.s32.totalorder %s2660_s22, %s2660_s22 }
  0x13   : > { %p2651_p7 = pneg %p2534_p6  ;;  %p2670_p13 = por %p2669_p12, %p2668_p11 }
  0x15   : > { %p2663_p9 = pnand %p2661_p8, %p2651_p7 }
  0x17   : > { %p2664_p10 = pneg %p2663_p9 }
  0x19   : > { %p2671_p0 = pnand %p2670_p13, %p2664_p10 }
  0x1b   : > { %2674 = shalt.err (!%p2671_p0)
}
  0x1c   : > { %s2732_s23 = smov 128   ;;  %s2733_s24 = smov 8  }
  0x1d   : > { %s3275_s0 = sld [smem:[#allocation13_spill]] }
  0x1f   : > { %542 = sbr.rel (%p2848_p3) target bundleno = 3430 (0xd66), region = 76 }
  0x23   : > { %2536 = dma.hbm_to_vmem [thread:$0]  (!%p2534_p6), %s3275_s0, 256, %s444_s21, [#allocation4], %s2732_s23, %s2732_s23, %s2733_s24  }
  0x24   : > { %2712 = dma.done.wait (%p2854_p4), [#allocation4], 256  }
  0x25   : > { %2714 = vsyncadd (%p2854_p4), [#allocation4], 4294967040  ;;  %p622_p1 = scmp.lt.s32.totalorder %s2721_s29, 1  ;;  %s3276_s4 = sld [smem:[#allocation14_spill]] }
  0x26   : > { %s3277_s6 = sld [smem:[#allocation15_spill]]  ;;  %p2266_p2 = scmp.ne.s32.totalorder %s2721_s29, 0 }
  0x27   : > { %s2873_s27 = scalar_select %p622_p1, %s2721_s29, 1 }
  0x29   : > { %s2323_s23 = sshll.u32 %s2873_s27, 4  ;;  %s646_s15 = scalar_lea.vmem %s3255_s8, %s2873_s27 }
  0x2a   : > { %s649_s26 = scalar_lea.vmem %s3256_s9, %s2873_s27  ;;  %s665_s24 = scalar_lea.vmem %s3260_s13, %s2873_s27 }
  0x2b   : > { %s2891_s16 = scalar_lea.vmem %s3276_s4, %s2323_s23  ;;  %s2913_s4 = scalar_lea.vmem %s3257_s10, %s2323_s23 }
  0x2c   : > { %s2896_s30 = scalar_lea.vmem %s3277_s6, %s2323_s23  ;;  %s657_s6 = scalar_lea.vmem %s3258_s11, %s2873_s27 }
  0x2d   : > { %3278 = sst [smem:[#allocation12_spill]] %s2896_s30  ;;  %s2326_s30 = sshll.u32 %s2873_s27, 6 }
  0x2e   : > { %s2923_s19 = scalar_lea.vmem %s3259_s12, %s2326_s30  ;;  %670 = sbr.rel (%p2266_p2) target bundleno = 53 (0x35), region = 84 }
  0x33   : > { %v671_v0 = vld [vmem:[#allocation3] sm:$0xff]  ;;  %vm673_vm0 = vcmask 261120   ;;  %v672_v1 = vld [vmem:[#allocation3 + $0x8] sm:$0xff] }
  0x34   : > { %674 = vst.msk [vmem:[#allocation6] sm:$0xff] %vm673_vm0, %v671_v0  ;;  %675 = vst.msk [vmem:[#allocation6 + $0x8] sm:$0xff] %vm673_vm0, %v672_v1 }
  0x35 PF: > { %vm681_vm1 = vcmask 261120   ;;  %v2586_v16 = vld [vmem:[%s2891_s16 + $0x8] sm:$0xff]   ;;  %v2734_v17 = vmov 0.0   ;;  %vm2735_vm2 = vmmov 0   ;;  %v2587_v18 = vld [vmem:[%s2891_s16] sm:$0xff]   ;;  %s3279_s16 = scalar_lea.vmem %s3249_s2, %s2873_s27  ;;  %s3280_s28 = scalar_lea.vmem %s3250_s3, %s2873_s27  ;;  %vm798_vm3 = vcmask 64512  }
  0x36   : > { %2385 = vmatprep.subr.bf16.mxu0 %v2734_v17  ;;  %2389 = vmatprep.mubr.msk.bf16.mxu0 %vm2735_vm2, %v2734_v17  ;;  %v2267_v27 = vld [vmem:[%s3279_s16] ss:$0 sm:$0xff]  ;;  %s3281_s17 = scalar_lea.vmem %s3252_s5, %s2873_s27  ;;  %s2736_s14 = smov 96   ;;  %vm925_vm4 = vcmask 1043456   ;;  %vm1027_vm5 = vcmask 60416   ;;  %vm1266_vm6 = vcmask 126016  }
  0x37   : > { %2386 = vmatpush3.bf16.msra.mxu0 %v2586_v16  ;;  %2405 = vmatprep.subr.bf16.mxu1 %v2734_v17  ;;  %v2268_v31 = vld [vmem:[%s3280_s28] ss:$0 sm:$0xff]  ;;  %s2737_s21 = smov 64   ;;  %s2738_s29 = smov 88   ;;  %vm1505_vm7 = vcmask 191616   ;;  %vm1744_vm8 = vcmask 257216  }
  0x38   : > { %2387 = vmatprep.subr.bf16.mxu0 %v2734_v17  ;;  %2407 = vmatprep.mubr.msk.bf16.mxu1 %vm2735_vm2, %v2734_v17  ;;  %v2269_v36 = vld [vmem:[%s3281_s17] ss:$0 sm:$0xff]  ;;  %s2739_s30 = smov 120   ;;  %s2740_s16 = smov 56  }
  0x39   : > { %v2991_v50 = vld [vmem:[%s3248_s1] sm:$0xff]  ;;  %s2741_s23 = smov 80   ;;  %s2742_s25 = smov 112  }
  0x3a   : > { %s2743_s28 = smov 48   ;;  %s2744_s20 = smov 72  }
  0x3b   : > { %v2930_v2 = vld [vmem:[#allocation6] sm:$0xff]  ;;  %v2932_v3 = vld [vmem:[#allocation6 + $0x8] sm:$0xff]  ;;  %2388 = vmatpush3.bf16.msra.mxu0 %v2587_v18  ;;  %s2745_s0 = smov 104   ;;  %s2746_s17 = smov 40  }
  0x3c   : > { %v682_v4 = vsel %vm681_vm1, %v2930_v2, 0.0  ;;  %v685_v5 = vsel %vm681_vm1, %v2932_v3, 0.0  ;;  %2393 = vmatprep.subr.bf16.mxu0 %v2734_v17  ;;  %s2748_s18 = smov 16   ;;  %s3282_s22 = sld [smem:[#allocation12_spill]] }
  0x3d   : > { %683 = vadd.xlane.f32.xlu0 %v682_v4 }
  0x41   : > { %686 = vadd.xlane.f32.xlu0 %v685_v5 }
  0xc6   : > { %v684_v6 = vpop.xlane.xlu0 %683 }
  0xc7   : > { %v689_v7 = vmul.f32 0.03125, %v684_v6 }
  0xc9   : > { %v691_v8 = vsub.f32 %v2930_v2, %v689_v7 }
  0xca   : > { %v687_v9 = vpop.xlane.xlu0 %686 }
  0xcb   : > { %v690_v10 = vmul.f32 0.03125, %v687_v9  ;;  %v693_v11 = vmul.f32 %v691_v8, %v691_v8 }
  0xcd   : > { %v692_v12 = vsub.f32 %v2932_v3, %v690_v10  ;;  %v695_v13 = vsel %vm681_vm1, %v693_v11, 0.0 }
  0xce   : > { %696 = vadd.xlane.f32.xlu1 %v695_v13 }
  0xcf   : > { %v694_v14 = vmul.f32 %v692_v12, %v692_v12 }
  0xd1   : > { %v698_v15 = vsel %vm681_vm1, %v694_v14, 0.0 }
  0xd2   : > { %699 = vadd.xlane.f32.xlu1 %v698_v15 }
 0x157   : > { %v697_v19 = vpop.xlane.xlu1 %696 }
 0x158   : > { %v701_v20 = vmul.f32 0.03125, %v697_v19 }
 0x15a   : > { %v703_v21 = vadd.f32 1e-05, %v701_v20 }
 0x15b   : > { %v700_v22 = vpop.xlane.xlu1 %699 }
 0x15c   : > { %2601 = vrsqrt.f32 %v703_v21  ;;  %v702_v23 = vmul.f32 0.03125, %v700_v22 }
 0x15e   : > { %v704_v24 = vadd.f32 1e-05, %v702_v23 }
 0x160   : > { %2603 = vrsqrt.f32 %v704_v24 }
 0x169   : > { %v2602_v25 = vpop.eup %2601 }
 0x16a   : > { %v707_v26 = vmul.f32 %v2602_v25, %v691_v8 }
 0x16c   : > { %v715_v30 = vmul.f32 %v2267_v27, %v707_v26 }
 0x16d   : > { %v2604_v28 = vpop.eup %2603 }
 0x16e   : > { %v708_v29 = vmul.f32 %v2604_v28, %v692_v12  ;;  %v723_v33 = vadd.f32 %v2268_v31, %v715_v30 }
 0x170   : > { %v716_v32 = vmul.f32 %v2267_v27, %v708_v29 }
 0x172   : > { %v724_v34 = vadd.f32 %v2268_v31, %v716_v32 }
 0x174   : > { %v725_v35 = vpack.c.bf16 %v724_v34, %v723_v33 }
 0x176   : > { %2390 = vmatmul.mubr.msk.bf16.vlgmr.msra.gmra.mxu0 %vm681_vm1, %v725_v35 }
 0x177   : > { %2395 = vmatprep.mubr.msk.bf16.mxu0 %vm2735_vm2, %v2734_v17 }
 0x236   : > { %v786_v37 = vpop.f32.mrf.mxu0 }
 0x237   : > { %v787_v38 = vadd.f32 %v2269_v36, %v786_v37 }
 0x238   : > { %v2391_v39 = vpop.f32.mrf.mxu0 }
 0x239   : > { %v2970_v40 = vpack.c.bf16 %v787_v38, %v787_v38 }
 0x23a   : > { %v789_v41 = vpop.f32.mrf.mxu0 }
 0x23b   : > { %v790_v42 = vadd.f32 %v2269_v36, %v789_v41  ;;  %796 = vrot.lane.b32.xlu0 %v2970_v40, %s2736_s14 }
 0x23c   : > { %v2392_v43 = vpop.f32.mrf.mxu0 }
 0x23d   : > { %v2973_v44 = vpack.c.bf16 %v790_v42, %v790_v42 }
 0x23f   : > { %846 = vrot.lane.b32.xlu1 %v2973_v44, %s2736_s14  ;;  %s2747_s14 = smov 8  }
 0x2ad   : > { %v797_v45 = vpop.permute.xlu0 %796 }
 0x2ae   : > { %v803_v46 = vsel %vm798_vm3, %v797_v45, 0 }
 0x2af   : > { %2394 = vmatpush3.bf16.xpose.msra.mxu0 %v803_v46 }
 0x2b0   : > { %2399 = vmatprep.subr.bf16.mxu0 %v2734_v17 }
 0x2b1   : > { %v847_v47 = vpop.permute.xlu1 %846 }
 0x2b2   : > { %v852_v48 = vsel %vm798_vm3, %v847_v47, 0 }
 0x2b6   : > { %2396 = vmatmul.mubr.msk.bf16.vlgmr.msra.gmra.mxu0 %vm798_vm3, %v2970_v40 }
 0x2b7   : > { %2400 = vmatpush3.bf16.xpose.msra.mxu0 %v852_v48  ;;  %2401 = vmatprep.mubr.msk.bf16.mxu0 %vm2735_vm2, %v2734_v17 }
 0x2b8   : > { %2411 = vmatprep.subr.bf16.mxu0 %v2734_v17 }
 0x2be   : > { %2402 = vmatmul.mubr.msk.bf16.vlgmr.msra.gmra.mxu0 %vm798_vm3, %v2973_v44 }
 0x2bf   : > { %2413 = vmatprep.mubr.msk.bf16.mxu0 %vm2735_vm2, %v2734_v17 }
 0x376   : > { %v839_v49 = vpop.f32.mrf.mxu0 }
 0x377   : > { %v894_v51 = vmul.f32 0.35355338, %v839_v49 }
 0x378   : > { %v2397_v52 = vpop.f32.mrf.mxu0 }
 0x379   : > { %v896_v53 = vadd.f32 %v894_v51, %v2991_v50 }
 0x37a   : > { %v842_v54 = vpop.f32.mrf.mxu0 }
 0x37b   : > { %v898_v55 = vsel %vm798_vm3, %v896_v53, -inf }
 0x37c   : > { %899 = vmax.xlane.f32.xlu1 %v898_v55  ;;  %v2398_v56 = vpop.f32.mrf.mxu0 }
 0x37e   : > { %v888_v57 = vpop.f32.mrf.mxu0 }
 0x37f   : > { %v895_v58 = vmul.f32 0.35355338, %v888_v57 }
 0x380   : > { %v2403_v59 = vpop.f32.mrf.mxu0 }
 0x381   : > { %v897_v60 = vadd.f32 %v895_v58, %v2991_v50 }
 0x382   : > { %v891_v61 = vpop.f32.mrf.mxu0 }
 0x383   : > { %v901_v62 = vsel %vm798_vm3, %v897_v60, -inf }
 0x384   : > { %902 = vmax.xlane.f32.xlu0 %v901_v62  ;;  %v2404_v63 = vpop.f32.mrf.mxu0 }
 0x38d   : > { %969 = vrot.lane.b32.xlu1 %v2973_v44, %s2737_s21 }
 0x391   : > { %1032 = vrot.lane.b32.xlu1 %v2970_v40, %s2738_s29 }
 0x395   : > { %1082 = vrot.lane.b32.xlu1 %v2973_v44, %s2738_s29 }
 0x399   : > { %1080 = vrot.lane.b32.xlu1 %v2973_v44, %s2739_s30 }
 0x39a   : > { %920 = vrot.lane.b32.xlu0 %v2970_v40, %s2737_s21  ;;  %s2749_s21 = smov 24  }
 0x39d   : > { %1204 = vrot.lane.b32.xlu1 %v2973_v44, %s2740_s16 }
 0x39e   : > { %1030 = vrot.lane.b32.xlu0 %v2970_v40, %s2739_s30 }
 0x405   : > { %v900_v0 = vpop.xlane.xlu1 %899 }
 0x406   : > { %v904_v1 = vsub.f32 %v896_v53, %v900_v0 }
 0x408   : > { %v906_v4 = vmul.f32 1.442695, %v904_v1 }
 0x409   : > { %v970_v5 = vpop.permute.xlu1 %969 }
 0x40a   : > { %2605 = vpow2.f32 %v906_v4  ;;  %v975_v6 = vsel %vm925_vm4, %v970_v5, 0 }
 0x40b   : > { %2412 = vmatpush3.bf16.msra.mxu0 %v975_v6 }
 0x40c   : > { %2423 = vmatprep.subr.bf16.mxu0 %v2734_v17 }
 0x40d   : > { %v903_v7 = vpop.xlane.xlu0 %902  ;;  %v1033_v12 = vpop.permute.xlu1 %1032 }
 0x40e   : > { %v905_v8 = vsub.f32 %v897_v60, %v903_v7  ;;  %v1038_v15 = vsel %vm798_vm3, %v1033_v12, 0 }
 0x410   : > { %v908_v9 = vmul.f32 1.442695, %v905_v8 }
 0x411   : > { %v921_v10 = vpop.permute.xlu0 %920  ;;  %v1083_v16 = vpop.permute.xlu1 %1082 }
 0x412   : > { %2607 = vpow2.f32 %v908_v9  ;;  %v927_v11 = vsel %vm925_vm4, %v921_v10, 0  ;;  %v1088_v22 = vsel %vm798_vm3, %v1083_v16, 0 }
 0x413   : > { %2406 = vmatpush3.bf16.msra.mxu1 %v927_v11 }
 0x414   : > { %2417 = vmatprep.subr.bf16.mxu1 %v2734_v17 }
 0x415   : > { %v1081_v20 = vpop.permute.xlu1 %1080  ;;  %v1031_v21 = vpop.permute.xlu0 %1030 }
 0x417   : > { %v3009_v13 = vpop.eup %2605 }
 0x418   : > { %v918_v14 = vpack.c.bf16 %v3009_v13, %v3009_v13 }
 0x419   : > { %v1205_v23 = vpop.permute.xlu1 %1204 }
 0x41a   : > { %2408 = vmatmul.mubr.msk.bf16.vlgmr.msra.gmra.mxu1 %vm798_vm3, %v918_v14  ;;  %v1210_v24 = vsel %vm925_vm4, %v1205_v23, 0 }
 0x41b   : > { %2418 = vmatpush3.bf16.xpose.msra.mxu1 %v1038_v15  ;;  %2419 = vmatprep.mubr.msk.bf16.mxu1 %vm2735_vm2, %v2734_v17 }
 0x41c   : > { %2429 = vmatprep.subr.bf16.mxu1 %v2734_v17 }
 0x41f   : > { %v3018_v18 = vpop.eup %2607 }
 0x420   : > { %v919_v19 = vpack.c.bf16 %v3018_v18, %v3018_v18 }
 0x422   : > { %2414 = vmatmul.mubr.msk.bf16.vlgmr.msra.gmra.mxu0 %vm798_vm3, %v919_v19  ;;  %2420 = vmatmul.mubr.msk.bf16.vlgmr.msra.gmra.mxu1 %vm798_vm3, %v1031_v21 }
 0x423   : > { %2424 = vmatpush3.bf16.xpose.msra.mxu0 %v1088_v22  ;;  %2425 = vmatprep.mubr.msk.bf16.mxu0 %vm2735_vm2, %v2734_v17 }
 0x424   : > { %2435 = vmatprep.subr.bf16.mxu0 %v2734_v17  ;;  %2431 = vmatprep.mubr.msk.bf16.mxu1 %vm2735_vm2, %v2734_v17 }
 0x42a   : > { %2426 = vmatmul.mubr.msk.bf16.vlgmr.msra.gmra.mxu0 %vm798_vm3, %v1081_v20 }
 0x42b   : > { %2436 = vmatpush3.bf16.msra.mxu0 %v1210_v24  ;;  %2437 = vmatprep.mubr.msk.bf16.mxu0 %vm2735_vm2, %v2734_v17 }
 0x42c   : > { %2447 = vmatprep.subr.bf16.mxu0 %v2734_v17 }
 0x4da   : > { %v3035_v25 = vpop.f32.mrf.mxu1 }
 0x4dc   : > { %v2409_v26 = vpop.f32.mrf.mxu1 }
 0x4de   : > { %v966_v27 = vpop.f32.mrf.mxu1 }
 0x4e0   : > { %v2410_v28 = vpop.f32.mrf.mxu1 }
 0x4e2   : > { %v3037_v29 = vpop.f32.mrf.mxu0  ;;  %v1074_v30 = vpop.f32.mrf.mxu1 }
 0x4e3   : > { %v1130_v31 = vmul.f32 0.35355338, %v1074_v30 }
 0x4e4   : > { %v2415_v32 = vpop.f32.mrf.mxu0  ;;  %v2421_v33 = vpop.f32.mrf.mxu1 }
 0x4e5   : > { %v1132_v34 = vadd.f32 %v1130_v31, %v2991_v50 }
 0x4e6   : > { %v1014_v35 = vpop.f32.mrf.mxu0  ;;  %v1077_v36 = vpop.f32.mrf.mxu1 }
 0x4e7   : > { %v1134_v37 = vsel %vm798_vm3, %v1132_v34, -inf }
 0x4e8   : > { %1135 = vmax.xlane.f32.xlu0 %v1134_v37  ;;  %v2416_v38 = vpop.f32.mrf.mxu0  ;;  %v2422_v39 = vpop.f32.mrf.mxu1 }
 0x4ea   : > { %v1124_v41 = vpop.f32.mrf.mxu0 }
 0x4eb   : > { %v1131_v42 = vmul.f32 0.35355338, %v1124_v41 }
 0x4ec   : > { %v2427_v43 = vpop.f32.mrf.mxu0 }
 0x4ed   : > { %v1133_v45 = vadd.f32 %v1131_v42, %v2991_v50 }
 0x4ee   : > { %v1127_v46 = vpop.f32.mrf.mxu0 }
 0x4ef   : > { %v1137_v47 = vsel %vm798_vm3, %v1133_v45, -inf }
 0x4f0   : > { %1138 = vmax.xlane.f32.xlu1 %v1137_v47  ;;  %v2428_v48 = vpop.f32.mrf.mxu0 }
 0x4fe   : > { %1156 = vrot.lane.b32.xlu0 %v2970_v40, %s2740_s16  ;;  %s3283_s16 = scalar_lea.vmem %s3254_s7, %s2873_s27 }
 0x501   : > { %1321 = vrot.lane.b32.xlu1 %v2973_v44, %s2741_s23 }
 0x502   : > { %1271 = vrot.lane.b32.xlu0 %v2970_v40, %s2741_s23 }
 0x505   : > { %1319 = vrot.lane.b32.xlu1 %v2973_v44, %s2742_s25 }
 0x506   : > { %1269 = vrot.lane.b32.xlu0 %v2970_v40, %s2742_s25 }
 0x509   : > { %1443 = vrot.lane.b32.xlu1 %v2973_v44, %s2743_s28 }
 0x571   : > { %v1136_v49 = vpop.xlane.xlu0 %1135 }
 0x572   : > { %v1140_v51 = vsub.f32 %v1132_v34, %v1136_v49 }
 0x574   : > { %v1142_v52 = vmul.f32 1.442695, %v1140_v51 }
 0x575   : > { %v1157_v53 = vpop.permute.xlu0 %1156 }
 0x576   : > { %2609 = vpow2.f32 %v1142_v52  ;;  %v1162_v54 = vsel %vm925_vm4, %v1157_v53, 0 }
 0x577   : > { %2430 = vmatpush3.bf16.msra.mxu1 %v1162_v54 }
 0x578   : > { %2441 = vmatprep.subr.bf16.mxu1 %v2734_v17 }
 0x579   : > { %v1139_v55 = vpop.xlane.xlu1 %1138  ;;  %v1272_v59 = vpop.permute.xlu0 %1271 }
 0x57a   : > { %v1141_v56 = vsub.f32 %v1133_v45, %v1139_v55  ;;  %v1277_v61 = vsel %vm798_vm3, %v1272_v59, 0 }
 0x57c   : > { %v1144_v57 = vmul.f32 1.442695, %v1141_v56 }
 0x57d   : > { %v1322_v62 = vpop.permute.xlu1 %1321  ;;  %v1270_v1 = vpop.permute.xlu0 %1269 }
 0x57e   : > { %2611 = vpow2.f32 %v1144_v57  ;;  %v1327_v5 = vsel %vm798_vm3, %v1322_v62, 0 }
 0x581   : > { %v1320_v4 = vpop.permute.xlu1 %1319 }
 0x583   : > { %v3053_v58 = vpop.eup %2609 }
 0x584   : > { %v1154_v60 = vpack.c.bf16 %v3053_v58, %v3053_v58 }
 0x585   : > { %v1444_v6 = vpop.permute.xlu1 %1443 }
 0x586   : > { %2432 = vmatmul.mubr.msk.bf16.vlgmr.msra.gmra.mxu1 %vm798_vm3, %v1154_v60  ;;  %v1449_v7 = vsel %vm925_vm4, %v1444_v6, 0 }
 0x587   : > { %2442 = vmatpush3.bf16.xpose.msra.mxu1 %v1277_v61  ;;  %2443 = vmatprep.mubr.msk.bf16.mxu1 %vm2735_vm2, %v2734_v17 }
 0x588   : > { %2453 = vmatprep.subr.bf16.mxu1 %v2734_v17 }
 0x58b   : > { %v3062_v63 = vpop.eup %2611 }
 0x58c   : > { %v1155_v0 = vpack.c.bf16 %v3062_v63, %v3062_v63 }
 0x58e   : > { %2438 = vmatmul.mubr.msk.bf16.vlgmr.msra.gmra.mxu0 %vm798_vm3, %v1155_v0  ;;  %2444 = vmatmul.mubr.msk.bf16.vlgmr.msra.gmra.mxu1 %vm798_vm3, %v1270_v1 }
 0x58f   : > { %2448 = vmatpush3.bf16.xpose.msra.mxu0 %v1327_v5  ;;  %2449 = vmatprep.mubr.msk.bf16.mxu0 %vm2735_vm2, %v2734_v17 }
 0x590   : > { %2459 = vmatprep.subr.bf16.mxu0 %v2734_v17  ;;  %2455 = vmatprep.mubr.msk.bf16.mxu1 %vm2735_vm2, %v2734_v17 }
 0x596   : > { %2450 = vmatmul.mubr.msk.bf16.vlgmr.msra.gmra.mxu0 %vm798_vm3, %v1320_v4 }
 0x597   : > { %2460 = vmatpush3.bf16.msra.mxu0 %v1449_v7  ;;  %2461 = vmatprep.mubr.msk.bf16.mxu0 %vm2735_vm2, %v2734_v17 }
 0x598   : > { %2471 = vmatprep.subr.bf16.mxu0 %v2734_v17 }
 0x646   : > { %v3079_v8 = vpop.f32.mrf.mxu1 }
 0x648   : > { %v2433_v9 = vpop.f32.mrf.mxu1 }
 0x64a   : > { %v1201_v10 = vpop.f32.mrf.mxu1 }
 0x64c   : > { %v2434_v11 = vpop.f32.mrf.mxu1 }
 0x64e   : > { %v3081_v12 = vpop.f32.mrf.mxu0  ;;  %v1313_v14 = vpop.f32.mrf.mxu1 }
 0x64f   : > { %v1369_v15 = vmul.f32 0.35355338, %v1313_v14 }
 0x650   : > { %v2439_v16 = vpop.f32.mrf.mxu0  ;;  %v2445_v19 = vpop.f32.mrf.mxu1 }
 0x651   : > { %v1371_v20 = vadd.f32 %v1369_v15, %v2991_v50 }
 0x652   : > { %v1249_v21 = vpop.f32.mrf.mxu0  ;;  %v1316_v22 = vpop.f32.mrf.mxu1 }
 0x653   : > { %v1373_v23 = vsel %vm798_vm3, %v1371_v20, -inf }
 0x654   : > { %1374 = vmax.xlane.f32.xlu0 %v1373_v23  ;;  %v2440_v24 = vpop.f32.mrf.mxu0  ;;  %v2446_v26 = vpop.f32.mrf.mxu1  ;;  %v1146_v23 = vsel %vm798_vm3, %v3053_v58, 0.0 }
 0x656   : > { %v1363_v27 = vpop.f32.mrf.mxu0 }
 0x657   : > { %v1370_v28 = vmul.f32 0.35355338, %v1363_v27 }
 0x658   : > { %v2451_v30 = vpop.f32.mrf.mxu0 }
 0x659   : > { %v1372_v31 = vadd.f32 %v1370_v28, %v2991_v50 }
 0x65a   : > { %v1366_v32 = vpop.f32.mrf.mxu0 }
 0x65b   : > { %v1376_v33 = vsel %vm798_vm3, %v1372_v31, -inf }
 0x65c   : > { %1377 = vmax.xlane.f32.xlu1 %v1376_v33  ;;  %v2452_v34 = vpop.f32.mrf.mxu0 }
 0x66a   : > { %1395 = vrot.lane.b32.xlu0 %v2970_v40, %s2743_s28 }
 0x66d   : > { %1560 = vrot.lane.b32.xlu1 %v2973_v44, %s2744_s20 }
 0x66e   : > { %1510 = vrot.lane.b32.xlu0 %v2970_v40, %s2744_s20 }
 0x671   : > { %1558 = vrot.lane.b32.xlu1 %v2973_v44, %s2745_s0 }
 0x672   : > { %1508 = vrot.lane.b32.xlu0 %v2970_v40, %s2745_s0  ;;  %s2750_s0 = smov [#allocation6]  }
 0x6dd   : > { %v1375_v35 = vpop.xlane.xlu0 %1374 }
 0x6de   : > { %v1379_v36 = vsub.f32 %v1371_v20, %v1375_v35 }
 0x6e0   : > { %v1381_v37 = vmul.f32 1.442695, %v1379_v36 }
 0x6e1   : > { %v1396_v38 = vpop.permute.xlu0 %1395 }
 0x6e2   : > { %2613 = vpow2.f32 %v1381_v37  ;;  %v1401_v39 = vsel %vm925_vm4, %v1396_v38, 0  ;;  %v910_v37 = vsel %vm798_vm3, %v3009_v13, 0.0 }
 0x6e3   : > { %2454 = vmatpush3.bf16.msra.mxu1 %v1401_v39 }
 0x6e4   : > { %2465 = vmatprep.subr.bf16.mxu1 %v2734_v17 }
 0x6e5   : > { %v1378_v41 = vpop.xlane.xlu1 %1377  ;;  %v1511_v46 = vpop.permute.xlu0 %1510 }
 0x6e6   : > { %v1380_v42 = vsub.f32 %v1372_v31, %v1378_v41  ;;  %v1516_v48 = vsel %vm798_vm3, %v1511_v46, 0 }
 0x6e8   : > { %v1383_v43 = vmul.f32 1.442695, %v1380_v42  ;;  %v913_v42 = vsel %vm798_vm3, %v3018_v18, 0.0 }
 0x6e9   : > { %v1561_v51 = vpop.permute.xlu1 %1560  ;;  %v1509_v53 = vpop.permute.xlu0 %1508 }
 0x6ea   : > { %2615 = vpow2.f32 %v1383_v43  ;;  %v1566_v54 = vsel %vm798_vm3, %v1561_v51, 0 }
 0x6ed   : > { %v1559_v55 = vpop.permute.xlu1 %1558 }
 0x6ef   : > { %v2614_v45 = vpop.eup %2613 }
 0x6f0   : > { %v1393_v47 = vpack.c.bf16 %v2614_v45, %v2614_v45  ;;  %v1385_v24 = vsel %vm798_vm3, %v2614_v45, 0.0 }
 0x6f2   : > { %2456 = vmatmul.mubr.msk.bf16.vlgmr.msra.gmra.mxu1 %vm798_vm3, %v1393_v47 }
 0x6f3   : > { %2466 = vmatpush3.bf16.xpose.msra.mxu1 %v1516_v48  ;;  %2467 = vmatprep.mubr.msk.bf16.mxu1 %vm2735_vm2, %v2734_v17 }
 0x6f4   : > { %2477 = vmatprep.subr.bf16.mxu1 %v2734_v17 }
 0x6f7   : > { %v2616_v49 = vpop.eup %2615 }
 0x6f8   : > { %v1394_v52 = vpack.c.bf16 %v2616_v49, %v2616_v49  ;;  %v1388_v26 = vsel %vm798_vm3, %v2616_v49, 0.0 }
 0x6fa   : > { %2462 = vmatmul.mubr.msk.bf16.vlgmr.msra.gmra.mxu0 %vm798_vm3, %v1394_v52  ;;  %2468 = vmatmul.mubr.msk.bf16.vlgmr.msra.gmra.mxu1 %vm798_vm3, %v1509_v53 }
 0x6fb   : > { %2472 = vmatpush3.bf16.xpose.msra.mxu0 %v1566_v54  ;;  %2473 = vmatprep.mubr.msk.bf16.mxu0 %vm2735_vm2, %v2734_v17 }
 0x6fc   : > { %2483 = vmatprep.subr.bf16.mxu0 %v2734_v17  ;;  %2479 = vmatprep.mubr.msk.bf16.mxu1 %vm2735_vm2, %v2734_v17 }
 0x702   : > { %2474 = vmatmul.mubr.msk.bf16.vlgmr.msra.gmra.mxu0 %vm798_vm3, %v1559_v55 }
 0x703   : > { %2485 = vmatprep.mubr.msk.bf16.mxu0 %vm2735_vm2, %v2734_v17 }
 0x7b2   : > { %v3111_v56 = vpop.f32.mrf.mxu1 }
 0x7b4   : > { %v2457_v57 = vpop.f32.mrf.mxu1 }
 0x7b6   : > { %v1440_v59 = vpop.f32.mrf.mxu1 }
 0x7b8   : > { %v2458_v60 = vpop.f32.mrf.mxu1 }
 0x7ba   : > { %v3113_v61 = vpop.f32.mrf.mxu0  ;;  %v1552_v62 = vpop.f32.mrf.mxu1 }
 0x7bb   : > { %v1608_v0 = vmul.f32 0.35355338, %v1552_v62 }
 0x7bc   : > { %v2463_v1 = vpop.f32.mrf.mxu0  ;;  %v2469_v4 = vpop.f32.mrf.mxu1 }
 0x7bd   : > { %v1610_v5 = vadd.f32 %v1608_v0, %v2991_v50 }
 0x7be   : > { %v1488_v6 = vpop.f32.mrf.mxu0  ;;  %v1555_v7 = vpop.f32.mrf.mxu1 }
 0x7bf   : > { %v1612_v9 = vsel %vm798_vm3, %v1610_v5, -inf }
 0x7c0   : > { %1613 = vmax.xlane.f32.xlu0 %v1612_v9  ;;  %v2464_v10 = vpop.f32.mrf.mxu0  ;;  %v2470_v11 = vpop.f32.mrf.mxu1 }
 0x7c2   : > { %v1602_v14 = vpop.f32.mrf.mxu0 }
 0x7c3   : > { %v1609_v15 = vmul.f32 0.35355338, %v1602_v14 }
 0x7c4   : > { %v2475_v16 = vpop.f32.mrf.mxu0 }
 0x7c5   : > { %v1611_v19 = vadd.f32 %v1609_v15, %v2991_v50  ;;  %v1149_v50 = vsel %vm798_vm3, %v3062_v63, 0.0  ;;  %v2588_v15 = vld [vmem:[%s3282_s22 + $0x8] sm:$0xff]  }
 0x7c6   : > { %v1605_v20 = vpop.f32.mrf.mxu0 }
 0x7c7   : > { %v1615_v21 = vsel %vm798_vm3, %v1611_v19, -inf }
 0x7c8   : > { %1616 = vmax.xlane.f32.xlu1 %v1615_v21  ;;  %v2476_v22 = vpop.f32.mrf.mxu0 }
 0x7d6   : > { %1634 = vrot.lane.b32.xlu0 %v2970_v40, %s2746_s17 }
 0x7d9   : > { %1682 = vrot.lane.b32.xlu1 %v2973_v44, %s2746_s17  ;;  %s2077_s17 = sshll.u32 %s2750_s0, 4  ;;  %s2078_s17 = int_to_ptr.vmem [resolvable:$true] %s2077_s17 }
 0x7da   : > { %s2675_s27 = scalar_lea.vmem %s2078_s17, 256  ;;  %p2682_p7 = scmp.lt.s32.totalorder %s2078_s17, %s2078_s17 }
 0x7db   : > { %p2676_p4 = scmp.ne.s32.totalorder %s2078_s17, %s2675_s27  ;;  %p2683_p8 = scmp.lt.s32.totalorder %s2675_s27, %s2675_s27 }
 0x7dd   : > { %p2684_p9 = por %p2683_p8, %p2682_p7 }
 0x7f5   : > { %1147 = vadd.xlane.f32.xlu0 %v1146_v23 }
 0x7f9   : > { %1386 = vadd.xlane.f32.xlu0 %v1385_v24 }
 0x7fd   : > { %1389 = vadd.xlane.f32.xlu0 %v1388_v26  ;;  %1150 = vadd.xlane.f32.xlu1 %v1149_v50 }
 0x849   : > { %v1614_v27 = vpop.xlane.xlu0 %1613 }
 0x84a   : > { %v1618_v28 = vsub.f32 %v1610_v5, %v1614_v27 }
 0x84c   : > { %v1620_v30 = vmul.f32 1.442695, %v1618_v28 }
 0x84d   : > { %v1635_v40 = vpop.permute.xlu0 %1634 }
 0x84e   : > { %2617 = vpow2.f32 %v1620_v30  ;;  %v1640_v44 = vsel %vm925_vm4, %v1635_v40, 0 }
 0x84f   : > { %2478 = vmatpush3.bf16.msra.mxu1 %v1640_v44 }
 0x850   : > { %2489 = vmatprep.subr.bf16.mxu1 %v2734_v17 }
 0x851   : > { %v1617_v58 = vpop.xlane.xlu1 %1616 }
 0x852   : > { %v1619_v31 = vsub.f32 %v1611_v19, %v1617_v58  ;;  %v2589_v19 = vld [vmem:[%s3282_s22] sm:$0xff]  }
 0x854   : > { %v1622_v32 = vmul.f32 1.442695, %v1619_v31  ;;  %v2297_v31 = vld [vmem:[%s3283_s16] ss:$0 sm:$0xff] }
 0x855   : > { %v1683_v33 = vpop.permute.xlu1 %1682 }
 0x856   : > { %2619 = vpow2.f32 %v1622_v32  ;;  %v1688_v34 = vsel %vm925_vm4, %v1683_v33, 0 }
 0x857   : > { %2484 = vmatpush3.bf16.msra.mxu0 %v1688_v34 }
 0x858   : > { %2497 = vmatprep.subr.bf16.mxu0 %v2734_v17 }
 0x85b   : > { %v2618_v63 = vpop.eup %2617 }
 0x85c   : > { %v1624_v35 = vsel %vm798_vm3, %v2618_v63, 0.0  ;;  %v1632_v36 = vpack.c.bf16 %v2618_v63, %v2618_v63 }
 0x85d   : > { %1625 = vadd.xlane.f32.xlu0 %v1624_v35 }
 0x85e   : > { %2480 = vmatmul.mubr.msk.bf16.vlgmr.msra.gmra.mxu1 %vm798_vm3, %v1632_v36 }
 0x85f   : > { %2493 = vmatprep.mubr.msk.bf16.mxu1 %vm2735_vm2, %v2734_v17  ;;  %2490 = vmatpush3.bf16.msra.mxu1 %v2588_v15  ;;  %v2599_v15 = vld [vmem:[%s2923_s19 + $0x8] sm:$0xff]  }
 0x860   : > { %2491 = vmatprep.subr.bf16.mxu1 %v2734_v17 }
 0x861   : > { %911 = vadd.xlane.f32.xlu0 %v910_v37 }
 0x863   : > { %v2620_v38 = vpop.eup %2619  ;;  %2492 = vmatpush3.bf16.msra.mxu1 %v2589_v19 }
 0x864   : > { %v1627_v39 = vsel %vm798_vm3, %v2620_v38, 0.0  ;;  %v1633_v41 = vpack.c.bf16 %v2620_v38, %v2620_v38  ;;  %2505 = vmatprep.subr.bf16.mxu1 %v2734_v17 }
 0x865   : > { %1628 = vadd.xlane.f32.xlu1 %v1627_v39 }
 0x866   : > { %2486 = vmatmul.mubr.msk.bf16.vlgmr.msra.gmra.mxu0 %vm798_vm3, %v1633_v41 }
 0x867   : > { %2501 = vmatprep.mubr.msk.bf16.mxu0 %vm2735_vm2, %v2734_v17 }
 0x869   : > { %914 = vadd.xlane.f32.xlu1 %v913_v42 }
 0x87e   : > { %v1148_v43 = vpop.xlane.xlu0 %1147 }
 0x87f   : > { %2621 = vrcp.f32 %v1148_v43 }
 0x882   : > { %v1387_v45 = vpop.xlane.xlu0 %1386 }
 0x883   : > { %2623 = vrcp.f32 %v1387_v45 }
 0x886   : > { %v1151_v46 = vpop.xlane.xlu1 %1150  ;;  %v1390_v13 = vpop.xlane.xlu0 %1389 }
 0x887   : > { %2625 = vrcp.f32 %v1151_v46 }
 0x888   : > { %2627 = vrcp.f32 %v1390_v13 }
 0x88c   : > { %v2622_v47 = vpop.eup %2621 }
 0x88d   : > { %v1252_v48 = vmul.f32 %v2622_v47, %v3079_v8 }
 0x88f   : > { %v2329_v49 = vpack.c.bf16 %v1252_v48, %v1252_v48 }
 0x890   : > { %v2624_v51 = vpop.eup %2623 }
 0x891   : > { %1260 = vrot.lane.b32.xlu0 %v2329_v49, %s2747_s14  ;;  %v1491_v54 = vmul.f32 %v2624_v51, %v3111_v56  ;;  %v2591_v51 = vld [vmem:[%s2913_s4 + $0x8] sm:$0xff]  }
 0x892   : > { %2498 = vmatpush3.bf16.msra.mxu0 %v2591_v51 }
 0x893   : > { %v2331_v57 = vpack.c.bf16 %v1491_v54, %v1491_v54  ;;  %2499 = vmatprep.subr.bf16.mxu0 %v2734_v17 }
 0x894   : > { %v2626_v52 = vpop.eup %2625 }
 0x895   : > { %v1253_v18 = vmul.f32 %v2626_v52, %v3081_v12  ;;  %v2628_v55 = vpop.eup %2627  ;;  %v2592_v52 = vld [vmem:[%s2913_s4] sm:$0xff]  }
 0x896   : > { %v1492_v59 = vmul.f32 %v2628_v55, %v3113_v61  ;;  %2500 = vmatpush3.bf16.msra.mxu0 %v2592_v52 }
 0x897   : > { %v2330_v53 = vpack.c.bf16 %v1253_v18, %v1253_v18 }
 0x898   : > { %v2332_v8 = vpack.c.bf16 %v1492_v59, %v1492_v59 }
 0x899   : > { %1262 = vrot.lane.b32.xlu1 %v2330_v53, %s2747_s14 }
 0x89d   : > { %1499 = vrot.lane.b32.xlu1 %v2331_v57, %s2748_s18 }
 0x8a1   : > { %1501 = vrot.lane.b32.xlu1 %v2332_v8, %s2748_s18 }
 0x8e6   : > { %v1626_v60 = vpop.xlane.xlu0 %1625 }
 0x8ea   : > { %v912_v62 = vpop.xlane.xlu0 %911 }
 0x8eb   : > { %2629 = vrcp.f32 %v912_v62  ;;  %v2302_v62 = vld [vmem:[%s646_s15] ss:$0 sm:$0xff] }
 0x8ee   : > { %v1629_v0 = vpop.xlane.xlu1 %1628 }
 0x8f2   : > { %v915_v1 = vpop.xlane.xlu1 %914 }
 0x8f3   : > { %2631 = vrcp.f32 %v915_v1 }
 0x8f4   : > { %2633 = vrcp.f32 %v1626_v60 }
 0x8f5   : > { %2635 = vrcp.f32 %v1629_v0 }
 0x8f8   : > { %v2630_v12 = vpop.eup %2629 }
 0x8f9   : > { %v1017_v4 = vmul.f32 %v2630_v12, %v3035_v25 }
 0x8fb   : > { %v2327_v56 = vpack.c.bf16 %v1017_v4, %v1017_v4  ;;  %v2303_v4 = vld [vmem:[%s649_s26] ss:$0 sm:$0xff] }
 0x8fd   : > { %1028 = vst.msk [vmem:[#allocation2] sm:$0xf] %vm1027_vm5, %v2327_v56 }
 0x900   : > { %v2632_v5 = vpop.eup %2631 }
 0x901   : > { %v1018_v61 = vmul.f32 %v2632_v5, %v3037_v29  ;;  %v2634_v11 = vpop.eup %2633 }
 0x902   : > { %v2636_v23 = vpop.eup %2635 }
 0x903   : > { %v1261_v6 = vpop.permute.xlu0 %1260  ;;  %v2328_v7 = vpack.c.bf16 %v1018_v61, %v1018_v61 }
 0x904   : > { %1267 = vst.msk [vmem:[#allocation2] sm:$0xf] %vm1266_vm6, %v1261_v6 }
 0x905   : > { %1029 = vst.msk [vmem:[#allocation2 + $0x4] sm:$0xf] %vm1027_vm5, %v2328_v7  ;;  %v2593_v7 = vld [vmem:[%s2923_s19 + $0x38] sm:$0xff]  }
 0x90b   : > { %v1263_v9 = vpop.permute.xlu1 %1262 }
 0x90c   : > { %1268 = vst.msk [vmem:[#allocation2 + $0x4] sm:$0xf] %vm1266_vm6, %v1263_v9  ;;  %v2594_v9 = vld [vmem:[%s2923_s19 + $0x30] sm:$0xff]  }
 0x90f   : > { %v1500_v10 = vpop.permute.xlu1 %1499 }
 0x910   : > { %1506 = vst.msk [vmem:[#allocation2] sm:$0xf] %vm1505_vm7, %v1500_v10  ;;  %v2595_v10 = vld [vmem:[%s2923_s19 + $0x28] sm:$0xff]  }
 0x913   : > { %v1502_v25 = vpop.permute.xlu1 %1501 }
 0x914   : > { %1507 = vst.msk [vmem:[#allocation2 + $0x4] sm:$0xf] %vm1505_vm7, %v1502_v25  ;;  %v2596_v25 = vld [vmem:[%s2923_s19 + $0x20] sm:$0xff]  }
 0x91e   : > { %v1676_v14 = vpop.f32.mrf.mxu1 }
 0x91f   : > { %v1730_v16 = vmul.f32 %v2634_v11, %v1676_v14  ;;  %v2597_v11 = vld [vmem:[%s2923_s19 + $0x18] sm:$0xff]   ;;  %v2598_v14 = vld [vmem:[%s2923_s19 + $0x10] sm:$0xff]  }
 0x920   : > { %v2481_v29 = vpop.f32.mrf.mxu1 }
 0x921   : > { %v2333_v20 = vpack.c.bf16 %v1730_v16, %v1730_v16  ;;  %v2600_v16 = vld [vmem:[%s2923_s19] sm:$0xff]  }
 0x922   : > { %v1679_v21 = vpop.f32.mrf.mxu1  ;;  %v2304_v29 = vld [vmem:[%s657_s6] ss:$0 sm:$0xff]  ;;  %s3284_s6 = sld [smem:[#allocation10_spill]] }
 0x923   : > { %1738 = vrot.lane.b32.xlu0 %v2333_v20, %s2749_s21 }
 0x924   : > { %v2482_v22 = vpop.f32.mrf.mxu1 }
 0x926   : > { %v1724_v24 = vpop.f32.mrf.mxu0 }
 0x927   : > { %v1731_v26 = vmul.f32 %v2636_v23, %v1724_v24 }
 0x928   : > { %v2487_v50 = vpop.f32.mrf.mxu0  ;;  %s3285_s18 = sadd.s32 4294967295, %s3284_s6  }
 0x929   : > { %v2334_v27 = vpack.c.bf16 %v1731_v26, %v1731_v26  ;;  %p3220_p3 = scmp.eq.s32.totalorder %s3285_s18, 1 }
 0x92a   : > { %v1727_v28 = vpop.f32.mrf.mxu0 }
 0x92b   : > { %1740 = vrot.lane.b32.xlu1 %v2334_v27, %s2749_s21  ;;  %p2677_p5 = pnand %p2676_p4, %p3220_p3 }
 0x92c   : > { %v2488_v30 = vpop.f32.mrf.mxu0 }
 0x92d   : > { %p2678_p6 = pneg %p2677_p5 }
 0x92f   : > { %p2685_p10 = pnand %p2684_p9, %p2678_p6 }
 0x995   : > { %v1739_v40 = vpop.permute.xlu0 %1738 }
 0x996   : > { %1745 = vst.msk [vmem:[#allocation2] sm:$0xf] %vm1744_vm8, %v1739_v40 }
 0x99d   : > { %v1741_v44 = vpop.permute.xlu1 %1740 }
 0x99e   : > { %1746 = vst.msk [vmem:[#allocation2 + $0x4] sm:$0xf] %vm1744_vm8, %v1741_v44 }
 0x9a5   : > { %v2590_v58 = vld [vmem:[#allocation2] sm:$0xff]  }
 0x9a6   : > { %2494 = vmatmul.mubr.msk.bf16.vlgmr.msra.gmra.mxu1 %vm681_vm1, %v2590_v58 }
 0x9a7   : > { %2521 = vmatprep.mubr.msk.bf16.mxu1 %vm2735_vm2, %v2734_v17  ;;  %2506 = vmatpush3.bf16.msra.mxu1 %v2593_v7 }
 0x9a8   : > { %2507 = vmatprep.subr.bf16.mxu1 %v2734_v17 }
 0x9ab   : > { %2508 = vmatpush3.bf16.msra.mxu1 %v2594_v9 }
 0x9ac   : > { %2509 = vmatprep.subr.bf16.mxu1 %v2734_v17 }
 0x9af   : > { %2510 = vmatpush3.bf16.msra.mxu1 %v2595_v10 }
 0x9b0   : > { %2511 = vmatprep.subr.bf16.mxu1 %v2734_v17 }
 0x9b3   : > { %2512 = vmatpush3.bf16.msra.mxu1 %v2596_v25 }
 0x9b4   : > { %2513 = vmatprep.subr.bf16.mxu1 %v2734_v17 }
 0x9b7   : > { %2514 = vmatpush3.bf16.msra.mxu1 %v2597_v11 }
 0x9b8   : > { %2515 = vmatprep.subr.bf16.mxu1 %v2734_v17 }
 0x9bb   : > { %2516 = vmatpush3.bf16.msra.mxu1 %v2598_v14 }
 0x9bc   : > { %2517 = vmatprep.subr.bf16.mxu1 %v2734_v17 }
 0x9bf   : > { %2518 = vmatpush3.bf16.msra.mxu1 %v2599_v15 }
 0x9c0   : > { %2519 = vmatprep.subr.bf16.mxu1 %v2734_v17 }
 0x9c3   : > { %2520 = vmatpush3.bf16.msra.mxu1 %v2600_v16 }
 0xa66   : > { %v1814_v32 = vpop.f32.mrf.mxu1 }
 0xa67   : > { %v1815_v33 = vadd.f32 %v2297_v31, %v1814_v32 }
 0xa68   : > { %v2495_v34 = vpop.f32.mrf.mxu1 }
 0xa69   : > { %v3164_v63 = vadd.f32 %v1815_v33, %v2930_v2 }
 0xa6a   : > { %v1817_v35 = vpop.f32.mrf.mxu1 }
 0xa6b   : > { %v1818_v36 = vadd.f32 %v2297_v31, %v1817_v35  ;;  %v1825_v37 = vsel %vm681_vm1, %v3164_v63, 0.0  ;;  %v2310_v35 = vld [vmem:[%s665_s24] ss:$0 sm:$0xff] }
 0xa6c   : > { %1826 = vadd.xlane.f32.xlu0 %v1825_v37  ;;  %v2496_v38 = vpop.f32.mrf.mxu1 }
 0xa6d   : > { %v3169_v39 = vadd.f32 %v1818_v36, %v2932_v3 }
 0xa6f   : > { %v1828_v41 = vsel %vm681_vm1, %v3169_v39, 0.0 }
 0xa70   : > { %1829 = vadd.xlane.f32.xlu1 %v1828_v41 }
 0xaf5   : > { %v1827_v42 = vpop.xlane.xlu0 %1826 }
 0xaf6   : > { %v1831_v43 = vmul.f32 0.03125, %v1827_v42 }
 0xaf8   : > { %v1833_v2 = vsub.f32 %v3164_v63, %v1831_v43 }
 0xaf9   : > { %v1830_v45 = vpop.xlane.xlu1 %1829 }
 0xafa   : > { %v1832_v46 = vmul.f32 0.03125, %v1830_v45  ;;  %v1835_v13 = vmul.f32 %v1833_v2, %v1833_v2 }
 0xafc   : > { %v1834_v47 = vsub.f32 %v3169_v39, %v1832_v46  ;;  %v1837_v48 = vsel %vm681_vm1, %v1835_v13, 0.0 }
 0xafd   : > { %1838 = vadd.xlane.f32.xlu0 %v1837_v48 }
 0xafe   : > { %v1836_v49 = vmul.f32 %v1834_v47, %v1834_v47 }
 0xb00   : > { %v1840_v3 = vsel %vm681_vm1, %v1836_v49, 0.0 }
 0xb01   : > { %1841 = vadd.xlane.f32.xlu0 %v1840_v3 }
 0xb86   : > { %v1839_v18 = vpop.xlane.xlu0 %1838 }
 0xb87   : > { %v1843_v53 = vmul.f32 0.03125, %v1839_v18 }
 0xb89   : > { %v1845_v54 = vadd.f32 1e-05, %v1843_v53 }
 0xb8a   : > { %v1842_v55 = vpop.xlane.xlu0 %1841 }
 0xb8b   : > { %2637 = vrsqrt.f32 %v1845_v54  ;;  %v1844_v57 = vmul.f32 0.03125, %v1842_v55 }
 0xb8d   : > { %v1846_v59 = vadd.f32 1e-05, %v1844_v57 }
 0xb8f   : > { %2639 = vrsqrt.f32 %v1846_v59 }
 0xb98   : > { %v2638_v8 = vpop.eup %2637 }
 0xb99   : > { %v1849_v60 = vmul.f32 %v2638_v8, %v1833_v2 }
 0xb9b   : > { %v1857_v12 = vmul.f32 %v2302_v62, %v1849_v60 }
 0xb9c   : > { %v2640_v0 = vpop.eup %2639 }
 0xb9d   : > { %v1850_v1 = vmul.f32 %v2640_v0, %v1834_v47  ;;  %v1865_v5 = vadd.f32 %v2303_v4, %v1857_v12 }
 0xb9f   : > { %v1858_v56 = vmul.f32 %v2302_v62, %v1850_v1 }
 0xba1   : > { %v1866_v61 = vadd.f32 %v2303_v4, %v1858_v56 }
 0xba3   : > { %v1867_v6 = vpack.c.bf16 %v1866_v61, %v1865_v5 }
 0xba5   : > { %2502 = vmatmul.mubr.msk.bf16.vlgmr.msra.gmra.mxu0 %vm681_vm1, %v1867_v6 }
 0xc65   : > { %v1928_v19 = vpop.f32.mrf.mxu0 }
 0xc66   : > { %v1929_v20 = vadd.f32 %v2304_v29, %v1928_v19 }
 0xc67   : > { %v2503_v21 = vpop.f32.mrf.mxu0 }
 0xc68   : > { %v2308_v22 = vmul.f32 -1.702, %v1929_v20 }
 0xc69   : > { %v1931_v23 = vpop.f32.mrf.mxu0 }
 0xc6a   : > { %v1939_v24 = vmul.f32 1.442695, %v2308_v22  ;;  %v1932_v26 = vadd.f32 %v2304_v29, %v1931_v23 }
 0xc6b   : > { %v2504_v50 = vpop.f32.mrf.mxu0 }
 0xc6c   : > { %2641 = vpow2.f32 %v1939_v24  ;;  %v2309_v27 = vmul.f32 -1.702, %v1932_v26 }
 0xc6e   : > { %v1941_v28 = vmul.f32 1.442695, %v2309_v27 }
 0xc70   : > { %2643 = vpow2.f32 %v1941_v28 }
 0xc79   : > { %v2642_v17 = vpop.eup %2641 }
 0xc7a   : > { %v1943_v30 = vadd.f32 1.0, %v2642_v17 }
 0xc7c   : > { %2645 = vrcp.f32 %v1943_v30 }
 0xc7d   : > { %v2644_v40 = vpop.eup %2643 }
 0xc7e   : > { %v1944_v44 = vadd.f32 1.0, %v2644_v40 }
 0xc80   : > { %2647 = vrcp.f32 %v1944_v44 }
 0xc89   : > { %v2646_v58 = vpop.eup %2645 }
 0xc8a   : > { %v1949_v32 = vmul.f32 %v2646_v58, %v1929_v20 }
 0xc8d   : > { %v2648_v31 = vpop.eup %2647 }
 0xc8e   : > { %v1950_v33 = vmul.f32 %v2648_v31, %v1932_v26 }
 0xc90   : > { %v1951_v34 = vpack.c.bf16 %v1950_v33, %v1949_v32 }
 0xc92   : > { %2522 = vmatmul.mubr.bf16.vlgmr.msra.gmra.mxu1 %v1951_v34 }
 0xd52   : > { %v2057_v36 = vpop.f32.mrf.mxu1 }
 0xd53   : > { %v2058_v37 = vadd.f32 %v2310_v35, %v2057_v36 }
 0xd54   : > { %v2523_v38 = vpop.f32.mrf.mxu1 }
 0xd55   : > { %v2064_v41 = vadd.f32 %v2058_v37, %v3164_v63 }
 0xd56   : > { %v2060_v42 = vpop.f32.mrf.mxu1 }
 0xd57   : > { %2066 = vst.msk [vmem:[#allocation6] sm:$0xff] %vm681_vm1, %v2064_v41  ;;  %v2061_v43 = vadd.f32 %v2310_v35, %v2060_v42 }
 0xd58   : > { %v2524_v2 = vpop.f32.mrf.mxu1 }
 0xd59   : > { %v2065_v45 = vadd.f32 %v2061_v43, %v3169_v39 }
 0xd5b   : > { %2067 = vst.msk [vmem:[#allocation6 + $0x8] sm:$0xff] %vm681_vm1, %v2065_v45 }
 0xd5c   : > { %2688 = shalt.err (!%p2685_p10)
}
 0xd5d   : > { %s2751_s24 = smov 128   ;;  %s3287_s30 = sld [smem:[#allocation16_spill]] }
 0xd63   : > { %2530 = dma.vmem_to_hbm [thread:$0]  (%p3220_p3), %s2078_s17, 256, %s3287_s30, [#allocation5], %s2751_s24, %s2751_s24, %s2747_s14  }
 0xd64   : > { %2716 = dma.done.wait (%p3220_p3), [#allocation5], 256  }
 0xd65   : > { %2718 = vsyncadd (%p3220_p3), [#allocation5], 4294967040 }
 0xd66 PF: > { %s3288_s16 = sld [smem:[#allocation10_spill]] }
 0xd67   : > { %s3289_s29 = sld [smem:[#allocation9_spill]] }
 0xd68   : > { %s3290_s30 = sld [smem:[#allocation11_spill]] }
 0xd6c   : > { %s26_s15 = sadd.s32 1, %s3288_s16  }
 0xd6d   : > { %p23_p11 = scmp.ge.s32.totalorder %s26_s15, 4  }
 0xd6f   :  { %25 = sbr.rel (!%p23_p11) target bundleno = 8 (0x8), region = 147 }
 0xd74   :  { %2093 = vsyncpa [#allocation4], 1 }
 0xd75   :  { %2095 = vsyncpa [#allocation4 + $0x1], 1 }
 0xd76   :  { %2096 = vsyncpa [#allocation5], 1 }
 0xd77   :  { %2098 = vsyncpa [#allocation5 + $0x1], 1 }

</bundles_post_ra>
